<compile_context>
chip_gen: v6e
topology: v6e:2x2x1
jax: 0.10.0
libtpu: 0.0.40
codegen_flags: <defaults>
</compile_context>

<pallas_src>
import functools
import math

import jax
import jax.numpy as jnp
from jax.experimental import pallas as pl
from jax.experimental.pallas import tpu as pltpu


LANE = 128  # TPU lane width; classifier output is padded to this for dense stores


# ----------------------------------------------------------------------------
# Config
# ----------------------------------------------------------------------------

class Config:
    vocab_size = 64
    hidden_size = 32
    num_heads = 2
    head_dim = 16
    num_layers = 2
    intermediate_size = 64
    max_position = 16
    type_vocab_size = 2
    num_classes = 3
    ln_eps = 1e-12


# ----------------------------------------------------------------------------
# In-kernel helpers
# ----------------------------------------------------------------------------

def _layernorm(x, g, b, eps):
    """f32 layernorm over the last axis (residual already added by caller)."""
    mean = jnp.mean(x, axis=-1, keepdims=True)
    var = jnp.mean((x - mean) ** 2, axis=-1, keepdims=True)
    return (x - mean) * jax.lax.rsqrt(var + eps) * g + b


def _mm(a, w_bf16, b):
    """MXU matmul with f32 accumulation: a @ w + b.  Weight is pre-cast bf16."""
    y = jnp.dot(a.astype(jnp.bfloat16), w_bf16,
                preferred_element_type=jnp.float32)
    return y + b


# ----------------------------------------------------------------------------
# Fused encoder + pooler + classifier kernel
# grid = (num_layers,): hidden state for all B*S tokens stays resident in VMEM
# across the layer axis; logits are written on the last layer only.
# ----------------------------------------------------------------------------

def _encoder_kernel(h0_ref, mask_ref, emb_g_ref, emb_b_ref,
                    wqkv_ref, bqkv_ref, wo_ref, bo_ref,
                    ln1_g_ref, ln1_b_ref,
                    w1_ref, b1_ref, w2_ref, b2_ref,
                    ln2_g_ref, ln2_b_ref,
                    pool_w_ref, pool_b_ref, cls_w_ref, cls_b_ref,
                    o_ref, h_acc,
                    *, batch, seq_len, num_heads, head_dim, eps):
    layer = pl.program_id(0)
    n_layers = pl.num_programs(0)
    scale = 1.0 / math.sqrt(head_dim)

    # layer 0: seed the resident hidden-state accumulator with LN(embeddings)
    @pl.when(layer == 0)
    def _():
        h_acc[...] = _layernorm(h0_ref[...].astype(jnp.float32),
                                emb_g_ref[...], emb_b_ref[...], eps)

    x = h_acc[...]                                   # (B*S, H) f32
    H = x.shape[-1]

    # --- fused QKV projection over ALL tokens: one (B*S,H) @ (H,3H) matmul ---
    qkv = _mm(x, wqkv_ref[0], bqkv_ref[0])           # (B*S, 3H) f32
    mask = mask_ref[...]                             # (B, S) additive mask, f32
    wo_l = wo_ref[0]                                 # (H, H) bf16

    # --- attention: static loop over (batch, head); out-proj accumulated per
    #     head instead of a lane concatenate ---
    per_batch = []
    for b in range(batch):
        rows = slice(b * seq_len, (b + 1) * seq_len)
        mask_b = mask[b:b + 1, :]                    # (1, S) broadcast over queries
        acc_b = jnp.zeros((seq_len, H), jnp.float32)
        for hh in range(num_heads):
            c0 = hh * head_dim
            qh = qkv[rows, 0 * H + c0:0 * H + c0 + head_dim].astype(jnp.bfloat16)
            kh = qkv[rows, 1 * H + c0:1 * H + c0 + head_dim].astype(jnp.bfloat16)
            vh = qkv[rows, 2 * H + c0:2 * H + c0 + head_dim].astype(jnp.bfloat16)
            s = jax.lax.dot_general(qh, kh, (((1,), (1,)), ((), ())),
                                    preferred_element_type=jnp.float32)
            s = s * scale + mask_b
            s = s - jnp.max(s, axis=-1, keepdims=True)
            p = jnp.exp(s)
            p = p * pl.reciprocal(jnp.sum(p, axis=-1, keepdims=True), approx=True)
            ctx = jnp.dot(p.astype(jnp.bfloat16), vh,
                          preferred_element_type=jnp.float32)        # (S, hd)
            acc_b = acc_b + jnp.dot(ctx.astype(jnp.bfloat16),
                                    wo_l[c0:c0 + head_dim, :],
                                    preferred_element_type=jnp.float32)
        per_batch.append(acc_b)
    attn_out = jnp.concatenate(per_batch, axis=0) + bo_ref[0]        # (B*S, H)

    # --- residual + LN ---
    h1 = _layernorm(x + attn_out, ln1_g_ref[0], ln1_b_ref[0], eps)

    # --- FFN; residual folded into LN ---
    # TODO(synk): HF BERT default is exact (erf) GELU; tanh approximation used here.
    ffn = jax.nn.gelu(_mm(h1, w1_ref[0], b1_ref[0]), approximate=True)
    ffn = _mm(ffn, w2_ref[0], b2_ref[0])
    h2 = _layernorm(h1 + ffn, ln2_g_ref[0], ln2_b_ref[0], eps)

    h_acc[...] = h2

    # --- last layer: fused pooler + classifier epilogue; lane-dense output ---
    @pl.when(layer == n_layers - 1)
    def _():
        cls = jnp.concatenate([h2[b * seq_len:b * seq_len + 1, :]
                               for b in range(batch)], axis=0)        # (B, H)
        pooled = jnp.tanh(_mm(cls, pool_w_ref[...], pool_b_ref[...]))
        o_ref[...] = _mm(pooled, cls_w_ref[...], cls_b_ref[...]).astype(o_ref.dtype)


# ----------------------------------------------------------------------------
# Synthetic BERT + classification head ("RoBERT")
# ----------------------------------------------------------------------------

def init_params(key, cfg):
    def nrm(key, shape, scale=0.02):
        return scale * jax.random.normal(key, shape, dtype=jnp.float32)

    keys = iter(jax.random.split(key, 128))
    H, I = cfg.hidden_size, cfg.intermediate_size
    p = {
        "word_emb": nrm(next(keys), (cfg.vocab_size, H)),
        "pos_emb": nrm(next(keys), (cfg.max_position, H)),
        "type_emb": nrm(next(keys), (cfg.type_vocab_size, H)),
        "emb_ln_g": jnp.ones((H,), jnp.float32),
        "emb_ln_b": jnp.zeros((H,), jnp.float32),
        "layers": [],
        "pooler_w": nrm(next(keys), (H, H)),
        "pooler_b": jnp.zeros((H,), jnp.float32),
        "cls_w": nrm(next(keys), (H, cfg.num_classes)),
        "cls_b": jnp.zeros((cfg.num_classes,), jnp.float32),
    }
    for _ in range(cfg.num_layers):
        layer = {
            "wq": nrm(next(keys), (H, H)), "bq": jnp.zeros((H,), jnp.float32),
            "wk": nrm(next(keys), (H, H)), "bk": jnp.zeros((H,), jnp.float32),
            "wv": nrm(next(keys), (H, H)), "bv": jnp.zeros((H,), jnp.float32),
            "wo": nrm(next(keys), (H, H)), "bo": jnp.zeros((H,), jnp.float32),
            "ln1_g": jnp.ones((H,), jnp.float32), "ln1_b": jnp.zeros((H,), jnp.float32),
            "w1": nrm(next(keys), (H, I)), "b1": jnp.zeros((I,), jnp.float32),
            "w2": nrm(next(keys), (I, H)), "b2": jnp.zeros((H,), jnp.float32),
            "ln2_g": jnp.ones((H,), jnp.float32), "ln2_b": jnp.zeros((H,), jnp.float32),
        }
        p["layers"].append(layer)
    return p


def prepare_params(params, cfg):
    """One-time weight prep (hoisted out of the forward path): stack per-layer
    weights along a leading layer axis, fuse Q/K/V, pad the classifier to a
    128-lane slab, and pre-cast all matmul weights to bf16 (LN params and
    biases stay f32)."""
    H, C = cfg.hidden_size, cfg.num_classes
    ls = params["layers"]
    bf = jnp.bfloat16
    return {
        "word_emb": params["word_emb"],
        "pos_emb": params["pos_emb"],
        "type_emb": params["type_emb"],
        "emb_ln_g": params["emb_ln_g"].reshape(1, H),
        "emb_ln_b": params["emb_ln_b"].reshape(1, H),
        "wqkv": jnp.stack([jnp.concatenate([l["wq"], l["wk"], l["wv"]], axis=1)
                           for l in ls]).astype(bf),                  # (L, H, 3H)
        "bqkv": jnp.stack([jnp.concatenate([l["bq"], l["bk"], l["bv"]])[None, :]
                           for l in ls]),                             # (L, 1, 3H)
        "wo": jnp.stack([l["wo"] for l in ls]).astype(bf),            # (L, H, H)
        "bo": jnp.stack([l["bo"][None, :] for l in ls]),              # (L, 1, H)
        "ln1_g": jnp.stack([l["ln1_g"][None, :] for l in ls]),
        "ln1_b": jnp.stack([l["ln1_b"][None, :] for l in ls]),
        "w1": jnp.stack([l["w1"] for l in ls]).astype(bf),            # (L, H, I)
        "b1": jnp.stack([l["b1"][None, :] for l in ls]),              # (L, 1, I)
        "w2": jnp.stack([l["w2"] for l in ls]).astype(bf),            # (L, I, H)
        "b2": jnp.stack([l["b2"][None, :] for l in ls]),              # (L, 1, H)
        "ln2_g": jnp.stack([l["ln2_g"][None, :] for l in ls]),
        "ln2_b": jnp.stack([l["ln2_b"][None, :] for l in ls]),
        "pool_w": params["pooler_w"].astype(bf),                      # (H, H)
        "pool_b": params["pooler_b"].reshape(1, H),
        "cls_w_pad": jnp.zeros((H, LANE), jnp.float32)
                        .at[:, :C].set(params["cls_w"]).astype(bf),   # (H, 128)
        "cls_b_pad": jnp.zeros((1, LANE), jnp.float32)
                        .at[:, :C].set(params["cls_b"][None, :]),
    }


def robert_forward(pp, input_ids, attention_mask, cfg):
    B, S = input_ids.shape
    H, I, C, L = cfg.hidden_size, cfg.intermediate_size, cfg.num_classes, cfg.num_layers

    # ---- embeddings (gather glue in plain JAX), flattened to (B*S, H) ----
    # TODO(synk): token type embeddings hard-coded to segment 0.
    emb = (pp["word_emb"][input_ids]
           + pp["pos_emb"][:S][None, :, :]
           + pp["type_emb"][0][None, None, :]).reshape(B * S, H)

    # additive attention mask, HF-style: (1 - m) * -10000, shape (B, S)
    add_mask = (1.0 - attention_mask.astype(jnp.float32)) * -10000.0

    kernel = functools.partial(
        _encoder_kernel, batch=B, seq_len=S,
        num_heads=cfg.num_heads, head_dim=cfg.head_dim, eps=cfg.ln_eps)

    def full(shape):       # broadcast to every grid step (constant block index)
        return pl.BlockSpec(shape, lambda l: (0,) * len(shape))

    def per_layer(shape):  # indexed by the layer grid axis
        return pl.BlockSpec((1,) + shape, lambda l: (l,) + (0,) * len(shape))

    logits_pad = pl.pallas_call(
        kernel,
        out_shape=jax.ShapeDtypeStruct((B, LANE), jnp.float32),
        grid_spec=pltpu.PrefetchScalarGridSpec(
            num_scalar_prefetch=0,
            grid=(L,),
            in_specs=[
                full((B * S, H)),                 # raw embedding sum (flattened)
                full((B, S)),                     # additive attention mask
                full((1, H)), full((1, H)),       # emb LN gamma/beta
                per_layer((H, 3 * H)),            # fused wqkv (bf16)
                per_layer((1, 3 * H)),            # fused bqkv
                per_layer((H, H)),                # wo (bf16)
                per_layer((1, H)),                # bo
                per_layer((1, H)), per_layer((1, H)),   # ln1 gamma/beta
                per_layer((H, I)),                # w1 (bf16)
                per_layer((1, I)),                # b1
                per_layer((I, H)),                # w2 (bf16)
                per_layer((1, H)),                # b2
                per_layer((1, H)), per_layer((1, H)),   # ln2 gamma/beta
                full((H, H)), full((1, H)),       # pooler w (bf16) / b
                full((H, LANE)), full((1, LANE)), # padded classifier w (bf16) / b
            ],
            out_specs=pl.BlockSpec((B, LANE), lambda l: (0, 0)),
            scratch_shapes=[pltpu.VMEM((B * S, H), jnp.float32)],
        ),
        compiler_params=pltpu.CompilerParams(
            dimension_semantics=("arbitrary",)),
    )(emb, add_mask,
      pp["emb_ln_g"], pp["emb_ln_b"],
      pp["wqkv"], pp["bqkv"], pp["wo"], pp["bo"],
      pp["ln1_g"], pp["ln1_b"], pp["w1"], pp["b1"],
      pp["w2"], pp["b2"], pp["ln2_g"], pp["ln2_b"],
      pp["pool_w"], pp["pool_b"], pp["cls_w_pad"], pp["cls_b_pad"])

    return logits_pad[:, :C]


if __name__ == "__main__":
    cfg = Config()
    key = jax.random.PRNGKey(0)
    pkey, ikey = jax.random.split(key)

    params = init_params(pkey, cfg)
    prepped = prepare_params(params, cfg)   # one-time weight prep (not per call)

    B, S = 2, 8
    input_ids = jax.random.randint(ikey, (B, S), 0, cfg.vocab_size, dtype=jnp.int32)
    # mask out the last two tokens of the second sequence
    attention_mask = jnp.ones((B, S), dtype=jnp.int32).at[1, -2:].set(0)

    logits = robert_forward(prepped, input_ids, attention_mask, cfg)
    logits = jax.block_until_ready(logits)

    assert logits.shape == (B, cfg.num_classes)
    assert jnp.all(jnp.isfinite(logits))
    print("KERNEL_OK")
</pallas_src>

<mosaic_0001>
module attributes {stable_mosaic.version = 11 : i64} {
  func.func @_encoder_kernel(%arg0: i32, %arg1: memref<16x32xf32, #tpu.memory_space<vmem>>, %arg2: memref<2x8xf32, #tpu.memory_space<vmem>>, %arg3: memref<1x32xf32, #tpu.memory_space<vmem>>, %arg4: memref<1x32xf32, #tpu.memory_space<vmem>>, %arg5: memref<1x32x96xbf16, #tpu.memory_space<vmem>>, %arg6: memref<1x1x96xf32, #tpu.memory_space<vmem>>, %arg7: memref<1x32x32xbf16, #tpu.memory_space<vmem>>, %arg8: memref<1x1x32xf32, #tpu.memory_space<vmem>>, %arg9: memref<1x1x32xf32, #tpu.memory_space<vmem>>, %arg10: memref<1x1x32xf32, #tpu.memory_space<vmem>>, %arg11: memref<1x32x64xbf16, #tpu.memory_space<vmem>>, %arg12: memref<1x1x64xf32, #tpu.memory_space<vmem>>, %arg13: memref<1x64x32xbf16, #tpu.memory_space<vmem>>, %arg14: memref<1x1x32xf32, #tpu.memory_space<vmem>>, %arg15: memref<1x1x32xf32, #tpu.memory_space<vmem>>, %arg16: memref<1x1x32xf32, #tpu.memory_space<vmem>>, %arg17: memref<32x32xbf16, #tpu.memory_space<vmem>>, %arg18: memref<1x32xf32, #tpu.memory_space<vmem>>, %arg19: memref<32x128xbf16, #tpu.memory_space<vmem>>, %arg20: memref<1x128xf32, #tpu.memory_space<vmem>>, %arg21: memref<2x128xf32, #tpu.memory_space<vmem>>, %arg22: memref<16x32xf32, #tpu.memory_space<vmem>>) attributes {dimension_semantics = [#tpu.dimension_semantics<arbitrary>], iteration_bounds = array<i64: 2>, scalar_prefetch = 0 : i64, scratch_operands = 1 : i64, tpu.core_type = #tpu.core_type<tc>, window_params = [{pipeline_mode = #tpu.pipeline_mode<synchronous>, transform_indices = @transform_0, window_bounds = array<i64: 16, 32>}, {pipeline_mode = #tpu.pipeline_mode<synchronous>, transform_indices = @transform_1, window_bounds = array<i64: 2, 8>}, {pipeline_mode = #tpu.pipeline_mode<synchronous>, transform_indices = @transform_2, window_bounds = array<i64: 1, 32>}, {pipeline_mode = #tpu.pipeline_mode<synchronous>, transform_indices = @transform_3, window_bounds = array<i64: 1, 32>}, {transform_indices = @transform_4, window_bounds = array<i64: 1, 32, 96>}, {transform_indices = @transform_5, window_bounds = array<i64: 1, 1, 96>}, {transform_indices = @transform_6, window_bounds = array<i64: 1, 32, 32>}, {transform_indices = @transform_7, window_bounds = array<i64: 1, 1, 32>}, {transform_indices = @transform_8, window_bounds = array<i64: 1, 1, 32>}, {transform_indices = @transform_9, window_bounds = array<i64: 1, 1, 32>}, {transform_indices = @transform_10, window_bounds = array<i64: 1, 32, 64>}, {transform_indices = @transform_11, window_bounds = array<i64: 1, 1, 64>}, {transform_indices = @transform_12, window_bounds = array<i64: 1, 64, 32>}, {transform_indices = @transform_13, window_bounds = array<i64: 1, 1, 32>}, {transform_indices = @transform_14, window_bounds = array<i64: 1, 1, 32>}, {transform_indices = @transform_15, window_bounds = array<i64: 1, 1, 32>}, {pipeline_mode = #tpu.pipeline_mode<synchronous>, transform_indices = @transform_16, window_bounds = array<i64: 32, 32>}, {pipeline_mode = #tpu.pipeline_mode<synchronous>, transform_indices = @transform_17, window_bounds = array<i64: 1, 32>}, {pipeline_mode = #tpu.pipeline_mode<synchronous>, transform_indices = @transform_18, window_bounds = array<i64: 32, 128>}, {pipeline_mode = #tpu.pipeline_mode<synchronous>, transform_indices = @transform_19, window_bounds = array<i64: 1, 128>}, {pipeline_mode = #tpu.pipeline_mode<synchronous>, transform_indices = @transform_20, window_bounds = array<i64: 2, 128>}]} {
    %c0_i32 = arith.constant 0 : i32
    %0 = arith.cmpi eq, %arg0, %c0_i32 : i32
    %1 = arith.extui %0 : i1 to i32
    %c0_i32_0 = arith.constant 0 : i32
    %2 = arith.cmpi ne, %1, %c0_i32_0 : i32
    scf.if %2 {
      %c0_85 = arith.constant 0 : index
      %c0_86 = arith.constant 0 : index
      %219 = vector.load %arg1[%c0_85, %c0_86] : memref<16x32xf32, #tpu.memory_space<vmem>>, vector<16x32xf32>
      %c0_87 = arith.constant 0 : index
      %c0_88 = arith.constant 0 : index
      %220 = vector.load %arg3[%c0_87, %c0_88] : memref<1x32xf32, #tpu.memory_space<vmem>>, vector<1x32xf32>
      %c0_89 = arith.constant 0 : index
      %c0_90 = arith.constant 0 : index
      %221 = vector.load %arg4[%c0_89, %c0_90] : memref<1x32xf32, #tpu.memory_space<vmem>>, vector<1x32xf32>
      %cst_91 = arith.constant dense<0.000000e+00> : vector<16xf32>
      %222 = vector.multi_reduction <add>, %219, %cst_91 [1] : vector<16x32xf32> to vector<16xf32>
      %223 = vector.shape_cast %222 : vector<16xf32> to vector<16x1xf32>
      %cst_92 = arith.constant 3.200000e+01 : f32
      %224 = vector.broadcast %cst_92 : f32 to vector<16x1xf32>
      %225 = arith.divf %223, %224 : vector<16x1xf32>
      %226 = vector.broadcast %225 : vector<16x1xf32> to vector<16x32xf32>
      %227 = arith.subf %219, %226 : vector<16x32xf32>
      %228 = arith.mulf %227, %227 : vector<16x32xf32>
      %cst_93 = arith.constant dense<0.000000e+00> : vector<16xf32>
      %229 = vector.multi_reduction <add>, %228, %cst_93 [1] : vector<16x32xf32> to vector<16xf32>
      %230 = vector.shape_cast %229 : vector<16xf32> to vector<16x1xf32>
      %cst_94 = arith.constant 3.200000e+01 : f32
      %231 = vector.broadcast %cst_94 : f32 to vector<16x1xf32>
      %232 = arith.divf %230, %231 : vector<16x1xf32>
      %233 = vector.broadcast %225 : vector<16x1xf32> to vector<16x32xf32>
      %234 = arith.subf %219, %233 : vector<16x32xf32>
      %cst_95 = arith.constant 9.99999996E-13 : f32
      %235 = vector.broadcast %cst_95 : f32 to vector<16x1xf32>
      %236 = arith.addf %232, %235 : vector<16x1xf32>
      %237 = math.rsqrt %236 : vector<16x1xf32>
      %238 = vector.broadcast %237 : vector<16x1xf32> to vector<16x32xf32>
      %239 = arith.mulf %234, %238 : vector<16x32xf32>
      %240 = vector.broadcast %220 : vector<1x32xf32> to vector<16x32xf32>
      %241 = arith.mulf %239, %240 : vector<16x32xf32>
      %242 = vector.broadcast %221 : vector<1x32xf32> to vector<16x32xf32>
      %243 = arith.addf %241, %242 : vector<16x32xf32>
      %c0_96 = arith.constant 0 : index
      %c0_97 = arith.constant 0 : index
      %244 = vector.load %arg22[%c0_96, %c0_97] : memref<16x32xf32, #tpu.memory_space<vmem>>, vector<16x32xf32>
      tpu.vector_store %arg22[%c0_96, %c0_97], %243 {strides = array<i32>} : memref<16x32xf32, #tpu.memory_space<vmem>>, vector<16x32xf32>,
    } else {
    }
    %c0 = arith.constant 0 : index
    %c0_1 = arith.constant 0 : index
    %3 = vector.load %arg22[%c0, %c0_1] : memref<16x32xf32, #tpu.memory_space<vmem>>, vector<16x32xf32>
    %c0_2 = arith.constant 0 : index
    %c0_3 = arith.constant 0 : index
    %c0_4 = arith.constant 0 : index
    %4 = vector.load %arg5[%c0_2, %c0_3, %c0_4] : memref<1x32x96xbf16, #tpu.memory_space<vmem>>, vector<1x32x96xbf16>
    %5 = vector.shape_cast %4 : vector<1x32x96xbf16> to vector<32x96xbf16>
    %c0_5 = arith.constant 0 : index
    %c0_6 = arith.constant 0 : index
    %c0_7 = arith.constant 0 : index
    %6 = vector.load %arg6[%c0_5, %c0_6, %c0_7] : memref<1x1x96xf32, #tpu.memory_space<vmem>>, vector<1x1x96xf32>
    %7 = vector.shape_cast %6 : vector<1x1x96xf32> to vector<1x96xf32>
    %8 = arith.truncf %3 : vector<16x32xf32> to vector<16x32xbf16>
    %cst = arith.constant dense<0.000000e+00> : vector<16x96xf32>
    %9 = tpu.matmul %8, %5, %cst {dimension_numbers = #tpu.dot_dimension_numbers<[1], [0], [0], [1], [0, 0, 1, 1], [], []>} : vector<16x32xbf16>, vector<32x96xbf16>, vector<16x96xf32> -> vector<16x96xf32>
    %10 = vector.broadcast %7 : vector<1x96xf32> to vector<16x96xf32>
    %11 = arith.addf %9, %10 : vector<16x96xf32>
    %c0_8 = arith.constant 0 : index
    %c0_9 = arith.constant 0 : index
    %12 = vector.load %arg2[%c0_8, %c0_9] : memref<2x8xf32, #tpu.memory_space<vmem>>, vector<2x8xf32>
    %c0_10 = arith.constant 0 : index
    %c0_11 = arith.constant 0 : index
    %c0_12 = arith.constant 0 : index
    %13 = vector.load %arg7[%c0_10, %c0_11, %c0_12] : memref<1x32x32xbf16, #tpu.memory_space<vmem>>, vector<1x32x32xbf16>
    %14 = vector.shape_cast %13 : vector<1x32x32xbf16> to vector<32x32xbf16>
    %15 = vector.extract_strided_slice %12 {offsets = [0, 0], sizes = [1, 8], strides = [1, 1]} : vector<2x8xf32> to vector<1x8xf32>
    %cst_13 = arith.constant 0.000000e+00 : f32
    %16 = vector.broadcast %cst_13 : f32 to vector<8x32xf32>
    %17 = vector.extract_strided_slice %11 {offsets = [0, 0], sizes = [8, 16], strides = [1, 1]} : vector<16x96xf32> to vector<8x16xf32>
    %18 = arith.truncf %17 : vector<8x16xf32> to vector<8x16xbf16>
    %19 = vector.extract_strided_slice %11 {offsets = [0, 32], sizes = [8, 16], strides = [1, 1]} : vector<16x96xf32> to vector<8x16xf32>
    %20 = arith.truncf %19 : vector<8x16xf32> to vector<8x16xbf16>
    %21 = vector.extract_strided_slice %11 {offsets = [0, 64], sizes = [8, 16], strides = [1, 1]} : vector<16x96xf32> to vector<8x16xf32>
    %22 = arith.truncf %21 : vector<8x16xf32> to vector<8x16xbf16>
    %cst_14 = arith.constant dense<0.000000e+00> : vector<8x8xf32>
    %23 = tpu.matmul %18, %20, %cst_14 {dimension_numbers = #tpu.dot_dimension_numbers<[1], [1], [0], [0], [0, 0, 1, 0], [], []>} : vector<8x16xbf16>, vector<8x16xbf16>, vector<8x8xf32> -> vector<8x8xf32>
    %cst_15 = arith.constant 2.500000e-01 : f32
    %24 = vector.broadcast %cst_15 : f32 to vector<8x8xf32>
    %25 = arith.mulf %23, %24 : vector<8x8xf32>
    %26 = vector.broadcast %15 : vector<1x8xf32> to vector<8x8xf32>
    %27 = arith.addf %25, %26 : vector<8x8xf32>
    %cst_16 = arith.constant dense<0xFF800000> : vector<8xf32>
    %28 = vector.multi_reduction <maximumf>, %27, %cst_16 [1] : vector<8x8xf32> to vector<8xf32>
    %29 = vector.shape_cast %28 : vector<8xf32> to vector<8x1xf32>
    %30 = vector.broadcast %29 : vector<8x1xf32> to vector<8x8xf32>
    %31 = arith.subf %27, %30 : vector<8x8xf32>
    %32 = math.exp %31 : vector<8x8xf32>
    %cst_17 = arith.constant dense<0.000000e+00> : vector<8xf32>
    %33 = vector.multi_reduction <add>, %32, %cst_17 [1] : vector<8x8xf32> to vector<8xf32>
    %34 = vector.shape_cast %33 : vector<8xf32> to vector<8x1xf32>
    %35 = tpu.reciprocal %34 {approx = true} : vector<8x1xf32> -> vector<8x1xf32>
    %36 = vector.broadcast %35 : vector<8x1xf32> to vector<8x8xf32>
    %37 = arith.mulf %32, %36 : vector<8x8xf32>
    %38 = arith.truncf %37 : vector<8x8xf32> to vector<8x8xbf16>
    %cst_18 = arith.constant dense<0.000000e+00> : vector<8x16xf32>
    %39 = tpu.matmul %38, %22, %cst_18 {dimension_numbers = #tpu.dot_dimension_numbers<[1], [0], [0], [1], [0, 0, 1, 1], [], []>} : vector<8x8xbf16>, vector<8x16xbf16>, vector<8x16xf32> -> vector<8x16xf32>
    %40 = arith.truncf %39 : vector<8x16xf32> to vector<8x16xbf16>
    %41 = vector.extract_strided_slice %14 {offsets = [0, 0], sizes = [16, 32], strides = [1, 1]} : vector<32x32xbf16> to vector<16x32xbf16>
    %cst_19 = arith.constant dense<0.000000e+00> : vector<8x32xf32>
    %42 = tpu.matmul %40, %41, %cst_19 {dimension_numbers = #tpu.dot_dimension_numbers<[1], [0], [0], [1], [0, 0, 1, 1], [], []>} : vector<8x16xbf16>, vector<16x32xbf16>, vector<8x32xf32> -> vector<8x32xf32>
    %43 = arith.addf %16, %42 : vector<8x32xf32>
    %44 = vector.extract_strided_slice %11 {offsets = [0, 16], sizes = [8, 16], strides = [1, 1]} : vector<16x96xf32> to vector<8x16xf32>
    %45 = arith.truncf %44 : vector<8x16xf32> to vector<8x16xbf16>
    %46 = vector.extract_strided_slice %11 {offsets = [0, 48], sizes = [8, 16], strides = [1, 1]} : vector<16x96xf32> to vector<8x16xf32>
    %47 = arith.truncf %46 : vector<8x16xf32> to vector<8x16xbf16>
    %48 = vector.extract_strided_slice %11 {offsets = [0, 80], sizes = [8, 16], strides = [1, 1]} : vector<16x96xf32> to vector<8x16xf32>
    %49 = arith.truncf %48 : vector<8x16xf32> to vector<8x16xbf16>
    %cst_20 = arith.constant dense<0.000000e+00> : vector<8x8xf32>
    %50 = tpu.matmul %45, %47, %cst_20 {dimension_numbers = #tpu.dot_dimension_numbers<[1], [1], [0], [0], [0, 0, 1, 0], [], []>} : vector<8x16xbf16>, vector<8x16xbf16>, vector<8x8xf32> -> vector<8x8xf32>
    %cst_21 = arith.constant 2.500000e-01 : f32
    %51 = vector.broadcast %cst_21 : f32 to vector<8x8xf32>
    %52 = arith.mulf %50, %51 : vector<8x8xf32>
    %53 = vector.broadcast %15 : vector<1x8xf32> to vector<8x8xf32>
    %54 = arith.addf %52, %53 : vector<8x8xf32>
    %cst_22 = arith.constant dense<0xFF800000> : vector<8xf32>
    %55 = vector.multi_reduction <maximumf>, %54, %cst_22 [1] : vector<8x8xf32> to vector<8xf32>
    %56 = vector.shape_cast %55 : vector<8xf32> to vector<8x1xf32>
    %57 = vector.broadcast %56 : vector<8x1xf32> to vector<8x8xf32>
    %58 = arith.subf %54, %57 : vector<8x8xf32>
    %59 = math.exp %58 : vector<8x8xf32>
    %cst_23 = arith.constant dense<0.000000e+00> : vector<8xf32>
    %60 = vector.multi_reduction <add>, %59, %cst_23 [1] : vector<8x8xf32> to vector<8xf32>
    %61 = vector.shape_cast %60 : vector<8xf32> to vector<8x1xf32>
    %62 = tpu.reciprocal %61 {approx = true} : vector<8x1xf32> -> vector<8x1xf32>
    %63 = vector.broadcast %62 : vector<8x1xf32> to vector<8x8xf32>
    %64 = arith.mulf %59, %63 : vector<8x8xf32>
    %65 = arith.truncf %64 : vector<8x8xf32> to vector<8x8xbf16>
    %cst_24 = arith.constant dense<0.000000e+00> : vector<8x16xf32>
    %66 = tpu.matmul %65, %49, %cst_24 {dimension_numbers = #tpu.dot_dimension_numbers<[1], [0], [0], [1], [0, 0, 1, 1], [], []>} : vector<8x8xbf16>, vector<8x16xbf16>, vector<8x16xf32> -> vector<8x16xf32>
    %67 = arith.truncf %66 : vector<8x16xf32> to vector<8x16xbf16>
    %68 = vector.extract_strided_slice %14 {offsets = [16, 0], sizes = [16, 32], strides = [1, 1]} : vector<32x32xbf16> to vector<16x32xbf16>
    %cst_25 = arith.constant dense<0.000000e+00> : vector<8x32xf32>
    %69 = tpu.matmul %67, %68, %cst_25 {dimension_numbers = #tpu.dot_dimension_numbers<[1], [0], [0], [1], [0, 0, 1, 1], [], []>} : vector<8x16xbf16>, vector<16x32xbf16>, vector<8x32xf32> -> vector<8x32xf32>
    %70 = arith.addf %43, %69 : vector<8x32xf32>
    %71 = vector.extract_strided_slice %12 {offsets = [1, 0], sizes = [1, 8], strides = [1, 1]} : vector<2x8xf32> to vector<1x8xf32>
    %cst_26 = arith.constant 0.000000e+00 : f32
    %72 = vector.broadcast %cst_26 : f32 to vector<8x32xf32>
    %73 = vector.extract_strided_slice %11 {offsets = [8, 0], sizes = [8, 16], strides = [1, 1]} : vector<16x96xf32> to vector<8x16xf32>
    %74 = arith.truncf %73 : vector<8x16xf32> to vector<8x16xbf16>
    %75 = vector.extract_strided_slice %11 {offsets = [8, 32], sizes = [8, 16], strides = [1, 1]} : vector<16x96xf32> to vector<8x16xf32>
    %76 = arith.truncf %75 : vector<8x16xf32> to vector<8x16xbf16>
    %77 = vector.extract_strided_slice %11 {offsets = [8, 64], sizes = [8, 16], strides = [1, 1]} : vector<16x96xf32> to vector<8x16xf32>
    %78 = arith.truncf %77 : vector<8x16xf32> to vector<8x16xbf16>
    %cst_27 = arith.constant dense<0.000000e+00> : vector<8x8xf32>
    %79 = tpu.matmul %74, %76, %cst_27 {dimension_numbers = #tpu.dot_dimension_numbers<[1], [1], [0], [0], [0, 0, 1, 0], [], []>} : vector<8x16xbf16>, vector<8x16xbf16>, vector<8x8xf32> -> vector<8x8xf32>
    %cst_28 = arith.constant 2.500000e-01 : f32
    %80 = vector.broadcast %cst_28 : f32 to vector<8x8xf32>
    %81 = arith.mulf %79, %80 : vector<8x8xf32>
    %82 = vector.broadcast %71 : vector<1x8xf32> to vector<8x8xf32>
    %83 = arith.addf %81, %82 : vector<8x8xf32>
    %cst_29 = arith.constant dense<0xFF800000> : vector<8xf32>
    %84 = vector.multi_reduction <maximumf>, %83, %cst_29 [1] : vector<8x8xf32> to vector<8xf32>
    %85 = vector.shape_cast %84 : vector<8xf32> to vector<8x1xf32>
    %86 = vector.broadcast %85 : vector<8x1xf32> to vector<8x8xf32>
    %87 = arith.subf %83, %86 : vector<8x8xf32>
    %88 = math.exp %87 : vector<8x8xf32>
    %cst_30 = arith.constant dense<0.000000e+00> : vector<8xf32>
    %89 = vector.multi_reduction <add>, %88, %cst_30 [1] : vector<8x8xf32> to vector<8xf32>
    %90 = vector.shape_cast %89 : vector<8xf32> to vector<8x1xf32>
    %91 = tpu.reciprocal %90 {approx = true} : vector<8x1xf32> -> vector<8x1xf32>
    %92 = vector.broadcast %91 : vector<8x1xf32> to vector<8x8xf32>
    %93 = arith.mulf %88, %92 : vector<8x8xf32>
    %94 = arith.truncf %93 : vector<8x8xf32> to vector<8x8xbf16>
    %cst_31 = arith.constant dense<0.000000e+00> : vector<8x16xf32>
    %95 = tpu.matmul %94, %78, %cst_31 {dimension_numbers = #tpu.dot_dimension_numbers<[1], [0], [0], [1], [0, 0, 1, 1], [], []>} : vector<8x8xbf16>, vector<8x16xbf16>, vector<8x16xf32> -> vector<8x16xf32>
    %96 = arith.truncf %95 : vector<8x16xf32> to vector<8x16xbf16>
    %97 = vector.extract_strided_slice %14 {offsets = [0, 0], sizes = [16, 32], strides = [1, 1]} : vector<32x32xbf16> to vector<16x32xbf16>
    %cst_32 = arith.constant dense<0.000000e+00> : vector<8x32xf32>
    %98 = tpu.matmul %96, %97, %cst_32 {dimension_numbers = #tpu.dot_dimension_numbers<[1], [0], [0], [1], [0, 0, 1, 1], [], []>} : vector<8x16xbf16>, vector<16x32xbf16>, vector<8x32xf32> -> vector<8x32xf32>
    %99 = arith.addf %72, %98 : vector<8x32xf32>
    %100 = vector.extract_strided_slice %11 {offsets = [8, 16], sizes = [8, 16], strides = [1, 1]} : vector<16x96xf32> to vector<8x16xf32>
    %101 = arith.truncf %100 : vector<8x16xf32> to vector<8x16xbf16>
    %102 = vector.extract_strided_slice %11 {offsets = [8, 48], sizes = [8, 16], strides = [1, 1]} : vector<16x96xf32> to vector<8x16xf32>
    %103 = arith.truncf %102 : vector<8x16xf32> to vector<8x16xbf16>
    %104 = vector.extract_strided_slice %11 {offsets = [8, 80], sizes = [8, 16], strides = [1, 1]} : vector<16x96xf32> to vector<8x16xf32>
    %105 = arith.truncf %104 : vector<8x16xf32> to vector<8x16xbf16>
    %cst_33 = arith.constant dense<0.000000e+00> : vector<8x8xf32>
    %106 = tpu.matmul %101, %103, %cst_33 {dimension_numbers = #tpu.dot_dimension_numbers<[1], [1], [0], [0], [0, 0, 1, 0], [], []>} : vector<8x16xbf16>, vector<8x16xbf16>, vector<8x8xf32> -> vector<8x8xf32>
    %cst_34 = arith.constant 2.500000e-01 : f32
    %107 = vector.broadcast %cst_34 : f32 to vector<8x8xf32>
    %108 = arith.mulf %106, %107 : vector<8x8xf32>
    %109 = vector.broadcast %71 : vector<1x8xf32> to vector<8x8xf32>
    %110 = arith.addf %108, %109 : vector<8x8xf32>
    %cst_35 = arith.constant dense<0xFF800000> : vector<8xf32>
    %111 = vector.multi_reduction <maximumf>, %110, %cst_35 [1] : vector<8x8xf32> to vector<8xf32>
    %112 = vector.shape_cast %111 : vector<8xf32> to vector<8x1xf32>
    %113 = vector.broadcast %112 : vector<8x1xf32> to vector<8x8xf32>
    %114 = arith.subf %110, %113 : vector<8x8xf32>
    %115 = math.exp %114 : vector<8x8xf32>
    %cst_36 = arith.constant dense<0.000000e+00> : vector<8xf32>
    %116 = vector.multi_reduction <add>, %115, %cst_36 [1] : vector<8x8xf32> to vector<8xf32>
    %117 = vector.shape_cast %116 : vector<8xf32> to vector<8x1xf32>
    %118 = tpu.reciprocal %117 {approx = true} : vector<8x1xf32> -> vector<8x1xf32>
    %119 = vector.broadcast %118 : vector<8x1xf32> to vector<8x8xf32>
    %120 = arith.mulf %115, %119 : vector<8x8xf32>
    %121 = arith.truncf %120 : vector<8x8xf32> to vector<8x8xbf16>
    %cst_37 = arith.constant dense<0.000000e+00> : vector<8x16xf32>
    %122 = tpu.matmul %121, %105, %cst_37 {dimension_numbers = #tpu.dot_dimension_numbers<[1], [0], [0], [1], [0, 0, 1, 1], [], []>} : vector<8x8xbf16>, vector<8x16xbf16>, vector<8x16xf32> -> vector<8x16xf32>
    %123 = arith.truncf %122 : vector<8x16xf32> to vector<8x16xbf16>
    %124 = vector.extract_strided_slice %14 {offsets = [16, 0], sizes = [16, 32], strides = [1, 1]} : vector<32x32xbf16> to vector<16x32xbf16>
    %cst_38 = arith.constant dense<0.000000e+00> : vector<8x32xf32>
    %125 = tpu.matmul %123, %124, %cst_38 {dimension_numbers = #tpu.dot_dimension_numbers<[1], [0], [0], [1], [0, 0, 1, 1], [], []>} : vector<8x16xbf16>, vector<16x32xbf16>, vector<8x32xf32> -> vector<8x32xf32>
    %126 = arith.addf %99, %125 : vector<8x32xf32>
    %127 = tpu.concatenate %70, %126 in 0 : vector<8x32xf32>, vector<8x32xf32> -> vector<16x32xf32>
    %c0_39 = arith.constant 0 : index
    %c0_40 = arith.constant 0 : index
    %c0_41 = arith.constant 0 : index
    %128 = vector.load %arg8[%c0_39, %c0_40, %c0_41] : memref<1x1x32xf32, #tpu.memory_space<vmem>>, vector<1x1x32xf32>
    %129 = vector.shape_cast %128 : vector<1x1x32xf32> to vector<1x32xf32>
    %130 = vector.broadcast %129 : vector<1x32xf32> to vector<16x32xf32>
    %131 = arith.addf %127, %130 : vector<16x32xf32>
    %132 = arith.addf %3, %131 : vector<16x32xf32>
    %c0_42 = arith.constant 0 : index
    %c0_43 = arith.constant 0 : index
    %c0_44 = arith.constant 0 : index
    %133 = vector.load %arg9[%c0_42, %c0_43, %c0_44] : memref<1x1x32xf32, #tpu.memory_space<vmem>>, vector<1x1x32xf32>
    %134 = vector.shape_cast %133 : vector<1x1x32xf32> to vector<1x32xf32>
    %c0_45 = arith.constant 0 : index
    %c0_46 = arith.constant 0 : index
    %c0_47 = arith.constant 0 : index
    %135 = vector.load %arg10[%c0_45, %c0_46, %c0_47] : memref<1x1x32xf32, #tpu.memory_space<vmem>>, vector<1x1x32xf32>
    %136 = vector.shape_cast %135 : vector<1x1x32xf32> to vector<1x32xf32>
    %cst_48 = arith.constant dense<0.000000e+00> : vector<16xf32>
    %137 = vector.multi_reduction <add>, %132, %cst_48 [1] : vector<16x32xf32> to vector<16xf32>
    %138 = vector.shape_cast %137 : vector<16xf32> to vector<16x1xf32>
    %cst_49 = arith.constant 3.200000e+01 : f32
    %139 = vector.broadcast %cst_49 : f32 to vector<16x1xf32>
    %140 = arith.divf %138, %139 : vector<16x1xf32>
    %141 = vector.broadcast %140 : vector<16x1xf32> to vector<16x32xf32>
    %142 = arith.subf %132, %141 : vector<16x32xf32>
    %143 = arith.mulf %142, %142 : vector<16x32xf32>
    %cst_50 = arith.constant dense<0.000000e+00> : vector<16xf32>
    %144 = vector.multi_reduction <add>, %143, %cst_50 [1] : vector<16x32xf32> to vector<16xf32>
    %145 = vector.shape_cast %144 : vector<16xf32> to vector<16x1xf32>
    %cst_51 = arith.constant 3.200000e+01 : f32
    %146 = vector.broadcast %cst_51 : f32 to vector<16x1xf32>
    %147 = arith.divf %145, %146 : vector<16x1xf32>
    %148 = vector.broadcast %140 : vector<16x1xf32> to vector<16x32xf32>
    %149 = arith.subf %132, %148 : vector<16x32xf32>
    %cst_52 = arith.constant 9.99999996E-13 : f32
    %150 = vector.broadcast %cst_52 : f32 to vector<16x1xf32>
    %151 = arith.addf %147, %150 : vector<16x1xf32>
    %152 = math.rsqrt %151 : vector<16x1xf32>
    %153 = vector.broadcast %152 : vector<16x1xf32> to vector<16x32xf32>
    %154 = arith.mulf %149, %153 : vector<16x32xf32>
    %155 = vector.broadcast %134 : vector<1x32xf32> to vector<16x32xf32>
    %156 = arith.mulf %154, %155 : vector<16x32xf32>
    %157 = vector.broadcast %136 : vector<1x32xf32> to vector<16x32xf32>
    %158 = arith.addf %156, %157 : vector<16x32xf32>
    %c0_53 = arith.constant 0 : index
    %c0_54 = arith.constant 0 : index
    %c0_55 = arith.constant 0 : index
    %159 = vector.load %arg11[%c0_53, %c0_54, %c0_55] : memref<1x32x64xbf16, #tpu.memory_space<vmem>>, vector<1x32x64xbf16>
    %160 = vector.shape_cast %159 : vector<1x32x64xbf16> to vector<32x64xbf16>
    %c0_56 = arith.constant 0 : index
    %c0_57 = arith.constant 0 : index
    %c0_58 = arith.constant 0 : index
    %161 = vector.load %arg12[%c0_56, %c0_57, %c0_58] : memref<1x1x64xf32, #tpu.memory_space<vmem>>, vector<1x1x64xf32>
    %162 = vector.shape_cast %161 : vector<1x1x64xf32> to vector<1x64xf32>
    %163 = arith.truncf %158 : vector<16x32xf32> to vector<16x32xbf16>
    %cst_59 = arith.constant dense<0.000000e+00> : vector<16x64xf32>
    %164 = tpu.matmul %163, %160, %cst_59 {dimension_numbers = #tpu.dot_dimension_numbers<[1], [0], [0], [1], [0, 0, 1, 1], [], []>} : vector<16x32xbf16>, vector<32x64xbf16>, vector<16x64xf32> -> vector<16x64xf32>
    %165 = vector.broadcast %162 : vector<1x64xf32> to vector<16x64xf32>
    %166 = arith.addf %164, %165 : vector<16x64xf32>
    %167 = arith.mulf %166, %166 : vector<16x64xf32>
    %168 = arith.mulf %166, %167 : vector<16x64xf32>
    %cst_60 = arith.constant 4.471500e-02 : f32
    %169 = vector.broadcast %cst_60 : f32 to vector<16x64xf32>
    %170 = arith.mulf %169, %168 : vector<16x64xf32>
    %171 = arith.addf %166, %170 : vector<16x64xf32>
    %cst_61 = arith.constant 0.797884583 : f32
    %172 = vector.broadcast %cst_61 : f32 to vector<16x64xf32>
    %173 = arith.mulf %172, %171 : vector<16x64xf32>
    %174 = math.tanh %173 : vector<16x64xf32>
    %cst_62 = arith.constant 1.000000e+00 : f32
    %175 = vector.broadcast %cst_62 : f32 to vector<16x64xf32>
    %176 = arith.addf %175, %174 : vector<16x64xf32>
    %cst_63 = arith.constant 5.000000e-01 : f32
    %177 = vector.broadcast %cst_63 : f32 to vector<16x64xf32>
    %178 = arith.mulf %177, %176 : vector<16x64xf32>
    %179 = arith.mulf %166, %178 : vector<16x64xf32>
    %c0_64 = arith.constant 0 : index
    %c0_65 = arith.constant 0 : index
    %c0_66 = arith.constant 0 : index
    %180 = vector.load %arg13[%c0_64, %c0_65, %c0_66] : memref<1x64x32xbf16, #tpu.memory_space<vmem>>, vector<1x64x32xbf16>
    %181 = vector.shape_cast %180 : vector<1x64x32xbf16> to vector<64x32xbf16>
    %c0_67 = arith.constant 0 : index
    %c0_68 = arith.constant 0 : index
    %c0_69 = arith.constant 0 : index
    %182 = vector.load %arg14[%c0_67, %c0_68, %c0_69] : memref<1x1x32xf32, #tpu.memory_space<vmem>>, vector<1x1x32xf32>
    %183 = vector.shape_cast %182 : vector<1x1x32xf32> to vector<1x32xf32>
    %184 = arith.truncf %179 : vector<16x64xf32> to vector<16x64xbf16>
    %cst_70 = arith.constant dense<0.000000e+00> : vector<16x32xf32>
    %185 = tpu.matmul %184, %181, %cst_70 {dimension_numbers = #tpu.dot_dimension_numbers<[1], [0], [0], [1], [0, 0, 1, 1], [], []>} : vector<16x64xbf16>, vector<64x32xbf16>, vector<16x32xf32> -> vector<16x32xf32>
    %186 = vector.broadcast %183 : vector<1x32xf32> to vector<16x32xf32>
    %187 = arith.addf %185, %186 : vector<16x32xf32>
    %188 = arith.addf %158, %187 : vector<16x32xf32>
    %c0_71 = arith.constant 0 : index
    %c0_72 = arith.constant 0 : index
    %c0_73 = arith.constant 0 : index
    %189 = vector.load %arg15[%c0_71, %c0_72, %c0_73] : memref<1x1x32xf32, #tpu.memory_space<vmem>>, vector<1x1x32xf32>
    %190 = vector.shape_cast %189 : vector<1x1x32xf32> to vector<1x32xf32>
    %c0_74 = arith.constant 0 : index
    %c0_75 = arith.constant 0 : index
    %c0_76 = arith.constant 0 : index
    %191 = vector.load %arg16[%c0_74, %c0_75, %c0_76] : memref<1x1x32xf32, #tpu.memory_space<vmem>>, vector<1x1x32xf32>
    %192 = vector.shape_cast %191 : vector<1x1x32xf32> to vector<1x32xf32>
    %cst_77 = arith.constant dense<0.000000e+00> : vector<16xf32>
    %193 = vector.multi_reduction <add>, %188, %cst_77 [1] : vector<16x32xf32> to vector<16xf32>
    %194 = vector.shape_cast %193 : vector<16xf32> to vector<16x1xf32>
    %cst_78 = arith.constant 3.200000e+01 : f32
    %195 = vector.broadcast %cst_78 : f32 to vector<16x1xf32>
    %196 = arith.divf %194, %195 : vector<16x1xf32>
    %197 = vector.broadcast %196 : vector<16x1xf32> to vector<16x32xf32>
    %198 = arith.subf %188, %197 : vector<16x32xf32>
    %199 = arith.mulf %198, %198 : vector<16x32xf32>
    %cst_79 = arith.constant dense<0.000000e+00> : vector<16xf32>
    %200 = vector.multi_reduction <add>, %199, %cst_79 [1] : vector<16x32xf32> to vector<16xf32>
    %201 = vector.shape_cast %200 : vector<16xf32> to vector<16x1xf32>
    %cst_80 = arith.constant 3.200000e+01 : f32
    %202 = vector.broadcast %cst_80 : f32 to vector<16x1xf32>
    %203 = arith.divf %201, %202 : vector<16x1xf32>
    %204 = vector.broadcast %196 : vector<16x1xf32> to vector<16x32xf32>
    %205 = arith.subf %188, %204 : vector<16x32xf32>
    %cst_81 = arith.constant 9.99999996E-13 : f32
    %206 = vector.broadcast %cst_81 : f32 to vector<16x1xf32>
    %207 = arith.addf %203, %206 : vector<16x1xf32>
    %208 = math.rsqrt %207 : vector<16x1xf32>
    %209 = vector.broadcast %208 : vector<16x1xf32> to vector<16x32xf32>
    %210 = arith.mulf %205, %209 : vector<16x32xf32>
    %211 = vector.broadcast %190 : vector<1x32xf32> to vector<16x32xf32>
    %212 = arith.mulf %210, %211 : vector<16x32xf32>
    %213 = vector.broadcast %192 : vector<1x32xf32> to vector<16x32xf32>
    %214 = arith.addf %212, %213 : vector<16x32xf32>
    %c0_82 = arith.constant 0 : index
    %c0_83 = arith.constant 0 : index
    %215 = vector.load %arg22[%c0_82, %c0_83] : memref<16x32xf32, #tpu.memory_space<vmem>>, vector<16x32xf32>
    tpu.vector_store %arg22[%c0_82, %c0_83], %214 {strides = array<i32>} : memref<16x32xf32, #tpu.memory_space<vmem>>, vector<16x32xf32>,
    %c1_i32 = arith.constant 1 : i32
    %216 = arith.cmpi eq, %arg0, %c1_i32 : i32
    %217 = arith.extui %216 : i1 to i32
    %c0_i32_84 = arith.constant 0 : i32
    %218 = arith.cmpi ne, %217, %c0_i32_84 : i32
    scf.if %218 {
      %219 = vector.extract_strided_slice %214 {offsets = [0, 0], sizes = [1, 32], strides = [1, 1]} : vector<16x32xf32> to vector<1x32xf32>
      %220 = vector.extract_strided_slice %214 {offsets = [8, 0], sizes = [1, 32], strides = [1, 1]} : vector<16x32xf32> to vector<1x32xf32>
      %221 = tpu.concatenate %219, %220 in 0 : vector<1x32xf32>, vector<1x32xf32> -> vector<2x32xf32>
      %c0_85 = arith.constant 0 : index
      %c0_86 = arith.constant 0 : index
      %222 = vector.load %arg17[%c0_85, %c0_86] : memref<32x32xbf16, #tpu.memory_space<vmem>>, vector<32x32xbf16>
      %c0_87 = arith.constant 0 : index
      %c0_88 = arith.constant 0 : index
      %223 = vector.load %arg18[%c0_87, %c0_88] : memref<1x32xf32, #tpu.memory_space<vmem>>, vector<1x32xf32>
      %224 = arith.truncf %221 : vector<2x32xf32> to vector<2x32xbf16>
      %cst_89 = arith.constant dense<0.000000e+00> : vector<2x32xf32>
      %225 = tpu.matmul %224, %222, %cst_89 {dimension_numbers = #tpu.dot_dimension_numbers<[1], [0], [0], [1], [0, 0, 1, 1], [], []>} : vector<2x32xbf16>, vector<32x32xbf16>, vector<2x32xf32> -> vector<2x32xf32>
      %226 = vector.broadcast %223 : vector<1x32xf32> to vector<2x32xf32>
      %227 = arith.addf %225, %226 : vector<2x32xf32>
      %228 = math.tanh %227 : vector<2x32xf32>
      %c0_90 = arith.constant 0 : index
      %c0_91 = arith.constant 0 : index
      %229 = vector.load %arg19[%c0_90, %c0_91] : memref<32x128xbf16, #tpu.memory_space<vmem>>, vector<32x128xbf16>
      %c0_92 = arith.constant 0 : index
      %c0_93 = arith.constant 0 : index
      %230 = vector.load %arg20[%c0_92, %c0_93] : memref<1x128xf32, #tpu.memory_space<vmem>>, vector<1x128xf32>
      %231 = arith.truncf %228 : vector<2x32xf32> to vector<2x32xbf16>
      %cst_94 = arith.constant dense<0.000000e+00> : vector<2x128xf32>
      %232 = tpu.matmul %231, %229, %cst_94 {dimension_numbers = #tpu.dot_dimension_numbers<[1], [0], [0], [1], [0, 0, 1, 1], [], []>} : vector<2x32xbf16>, vector<32x128xbf16>, vector<2x128xf32> -> vector<2x128xf32>
      %233 = vector.broadcast %230 : vector<1x128xf32> to vector<2x128xf32>
      %234 = arith.addf %232, %233 : vector<2x128xf32>
      %c0_95 = arith.constant 0 : index
      %c0_96 = arith.constant 0 : index
      %235 = vector.load %arg21[%c0_95, %c0_96] : memref<2x128xf32, #tpu.memory_space<vmem>>, vector<2x128xf32>
      tpu.vector_store %arg21[%c0_95, %c0_96], %234 {strides = array<i32>} : memref<2x128xf32, #tpu.memory_space<vmem>>, vector<2x128xf32>,
    } else {
    }
    return
  }
  func.func @transform_0(%arg0: i32) -> (i32, i32) {
    %c0_i32 = arith.constant 0 : i32
    %c0_i32_0 = arith.constant 0 : i32
    %c0_i32_1 = arith.constant 0 : i32
    return %c0_i32, %c0_i32_0 : i32, i32
  }
  func.func @transform_1(%arg0: i32) -> (i32, i32) {
    %c0_i32 = arith.constant 0 : i32
    %c0_i32_0 = arith.constant 0 : i32
    %c0_i32_1 = arith.constant 0 : i32
    return %c0_i32, %c0_i32_0 : i32, i32
  }
  func.func @transform_2(%arg0: i32) -> (i32, i32) {
    %c0_i32 = arith.constant 0 : i32
    %c0_i32_0 = arith.constant 0 : i32
    %c0_i32_1 = arith.constant 0 : i32
    return %c0_i32, %c0_i32_0 : i32, i32
  }
  func.func @transform_3(%arg0: i32) -> (i32, i32) {
    %c0_i32 = arith.constant 0 : i32
    %c0_i32_0 = arith.constant 0 : i32
    %c0_i32_1 = arith.constant 0 : i32
    return %c0_i32, %c0_i32_0 : i32, i32
  }
  func.func @transform_4(%arg0: i32) -> (i32, i32, i32) {
    %c0_i32 = arith.constant 0 : i32
    %c0_i32_0 = arith.constant 0 : i32
    %c0_i32_1 = arith.constant 0 : i32
    return %arg0, %c0_i32, %c0_i32_0 : i32, i32, i32
  }
  func.func @transform_5(%arg0: i32) -> (i32, i32, i32) {
    %c0_i32 = arith.constant 0 : i32
    %c0_i32_0 = arith.constant 0 : i32
    %c0_i32_1 = arith.constant 0 : i32
    return %arg0, %c0_i32, %c0_i32_0 : i32, i32, i32
  }
  func.func @transform_6(%arg0: i32) -> (i32, i32, i32) {
    %c0_i32 = arith.constant 0 : i32
    %c0_i32_0 = arith.constant 0 : i32
    %c0_i32_1 = arith.constant 0 : i32
    return %arg0, %c0_i32, %c0_i32_0 : i32, i32, i32
  }
  func.func @transform_7(%arg0: i32) -> (i32, i32, i32) {
    %c0_i32 = arith.constant 0 : i32
    %c0_i32_0 = arith.constant 0 : i32
    %c0_i32_1 = arith.constant 0 : i32
    return %arg0, %c0_i32, %c0_i32_0 : i32, i32, i32
  }
  func.func @transform_8(%arg0: i32) -> (i32, i32, i32) {
    %c0_i32 = arith.constant 0 : i32
    %c0_i32_0 = arith.constant 0 : i32
    %c0_i32_1 = arith.constant 0 : i32
    return %arg0, %c0_i32, %c0_i32_0 : i32, i32, i32
  }
  func.func @transform_9(%arg0: i32) -> (i32, i32, i32) {
    %c0_i32 = arith.constant 0 : i32
    %c0_i32_0 = arith.constant 0 : i32
    %c0_i32_1 = arith.constant 0 : i32
    return %arg0, %c0_i32, %c0_i32_0 : i32, i32, i32
  }
  func.func @transform_10(%arg0: i32) -> (i32, i32, i32) {
    %c0_i32 = arith.constant 0 : i32
    %c0_i32_0 = arith.constant 0 : i32
    %c0_i32_1 = arith.constant 0 : i32
    return %arg0, %c0_i32, %c0_i32_0 : i32, i32, i32
  }
  func.func @transform_11(%arg0: i32) -> (i32, i32, i32) {
    %c0_i32 = arith.constant 0 : i32
    %c0_i32_0 = arith.constant 0 : i32
    %c0_i32_1 = arith.constant 0 : i32
    return %arg0, %c0_i32, %c0_i32_0 : i32, i32, i32
  }
  func.func @transform_12(%arg0: i32) -> (i32, i32, i32) {
    %c0_i32 = arith.constant 0 : i32
    %c0_i32_0 = arith.constant 0 : i32
    %c0_i32_1 = arith.constant 0 : i32
    return %arg0, %c0_i32, %c0_i32_0 : i32, i32, i32
  }
  func.func @transform_13(%arg0: i32) -> (i32, i32, i32) {
    %c0_i32 = arith.constant 0 : i32
    %c0_i32_0 = arith.constant 0 : i32
    %c0_i32_1 = arith.constant 0 : i32
    return %arg0, %c0_i32, %c0_i32_0 : i32, i32, i32
  }
  func.func @transform_14(%arg0: i32) -> (i32, i32, i32) {
    %c0_i32 = arith.constant 0 : i32
    %c0_i32_0 = arith.constant 0 : i32
    %c0_i32_1 = arith.constant 0 : i32
    return %arg0, %c0_i32, %c0_i32_0 : i32, i32, i32
  }
  func.func @transform_15(%arg0: i32) -> (i32, i32, i32) {
    %c0_i32 = arith.constant 0 : i32
    %c0_i32_0 = arith.constant 0 : i32
    %c0_i32_1 = arith.constant 0 : i32
    return %arg0, %c0_i32, %c0_i32_0 : i32, i32, i32
  }
  func.func @transform_16(%arg0: i32) -> (i32, i32) {
    %c0_i32 = arith.constant 0 : i32
    %c0_i32_0 = arith.constant 0 : i32
    %c0_i32_1 = arith.constant 0 : i32
    return %c0_i32, %c0_i32_0 : i32, i32
  }
  func.func @transform_17(%arg0: i32) -> (i32, i32) {
    %c0_i32 = arith.constant 0 : i32
    %c0_i32_0 = arith.constant 0 : i32
    %c0_i32_1 = arith.constant 0 : i32
    return %c0_i32, %c0_i32_0 : i32, i32
  }
  func.func @transform_18(%arg0: i32) -> (i32, i32) {
    %c0_i32 = arith.constant 0 : i32
    %c0_i32_0 = arith.constant 0 : i32
    %c0_i32_1 = arith.constant 0 : i32
    return %c0_i32, %c0_i32_0 : i32, i32
  }
  func.func @transform_19(%arg0: i32) -> (i32, i32) {
    %c0_i32 = arith.constant 0 : i32
    %c0_i32_0 = arith.constant 0 : i32
    %c0_i32_1 = arith.constant 0 : i32
    return %c0_i32, %c0_i32_0 : i32, i32
  }
  func.func @transform_20(%arg0: i32) -> (i32, i32) {
    %c0_i32 = arith.constant 0 : i32
    %c0_i32_0 = arith.constant 0 : i32
    %c0_i32_1 = arith.constant 0 : i32
    return %c0_i32, %c0_i32_0 : i32, i32
  }
}

</mosaic_0001>

<bundles_post_ra>
// kernel: tpu_custom_call.1
= control target key start
LH: loop header
LB: loop body
LE: loop exit
PB: predicated region body
PF: predicated region fallthrough
CT: control target
= control target key end

     0   :  { %s4007_s0 = inlined_call_operand.hbm [shape: f32[16,32], index: 0, kind: input, shape index: {}]   ;;  %s4008_s1 = inlined_call_operand.hbm [shape: f32[2,8], index: 1, kind: input, shape index: {}]   ;;  %s4009_s2 = inlined_call_operand.hbm [shape: f32[1,32], index: 2, kind: input, shape index: {}]   ;;  %s4010_s3 = inlined_call_operand.hbm [shape: f32[1,32], index: 3, kind: input, shape index: {}]   ;;  %s4011_s4 = inlined_call_operand.vmem [shape: bf16[2,32,96], index: 4, kind: input, shape index: {}]   ;;  %s4012_s5 = inlined_call_operand.hbm [shape: f32[2,1,96], index: 5, kind: input, shape index: {}]   ;;  %s4013_s6 = inlined_call_operand.vmem [shape: bf16[2,32,32], index: 6, kind: input, shape index: {}]   ;;  %s4014_s7 = inlined_call_operand.hbm [shape: f32[2,1,32], index: 7, kind: input, shape index: {}]   ;;  %s4015_s8 = inlined_call_operand.hbm [shape: f32[2,1,32], index: 8, kind: input, shape index: {}]   ;;  %s4016_s9 = inlined_call_operand.hbm [shape: f32[2,1,32], index: 9, kind: input, shape index: {}]   ;;  %s4017_s10 = inlined_call_operand.vmem [shape: bf16[2,32,64], index: 10, kind: input, shape index: {}]   ;;  %s4018_s11 = inlined_call_operand.hbm [shape: f32[2,1,64], index: 11, kind: input, shape index: {}]   ;;  %s4019_s12 = inlined_call_operand.vmem [shape: bf16[2,64,32], index: 12, kind: input, shape index: {}]   ;;  %s4020_s13 = inlined_call_operand.hbm [shape: f32[2,1,32], index: 13, kind: input, shape index: {}]   ;;  %s4021_s14 = inlined_call_operand.hbm [shape: f32[2,1,32], index: 14, kind: input, shape index: {}]   ;;  %s4022_s15 = inlined_call_operand.hbm [shape: f32[2,1,32], index: 15, kind: input, shape index: {}]   ;;  %s4023_s16 = inlined_call_operand.vmem [shape: bf16[32,32], index: 16, kind: input, shape index: {}]   ;;  %s4024_s17 = inlined_call_operand.hbm [shape: f32[1,32], index: 17, kind: input, shape index: {}]   ;;  %s4025_s18 = inlined_call_operand.vmem [shape: bf16[32,128], index: 18, kind: input, shape index: {}]   ;;  %s4026_s19 = inlined_call_operand.vmem [shape: f32[1,128], index: 19, kind: input, shape index: {}]   ;;  %s4027_s20 = inlined_call_operand.hbm [shape: f32[2,128], index: 20, kind: output, shape index: {}]  }
   0x1   :  { %4046 = sst [smem:[#allocation32_spill]] %s4007_s0 }
   0x2   :  { %4047 = sst [smem:[#allocation33_spill]] %s4008_s1 }
   0x3   :  { %4048 = sst [smem:[#allocation34_spill]] %s4009_s2 }
   0x4   :  { %4049 = sst [smem:[#allocation35_spill]] %s4010_s3 }
   0x5   :  { %4050 = sst [smem:[#allocation36_spill]] %s4011_s4 }
   0x6   :  { %4051 = sst [smem:[#allocation37_spill]] %s4013_s6 }
   0x7   :  { %4052 = sst [smem:[#allocation38_spill]] %s4017_s10 }
   0x8   :  { %4053 = sst [smem:[#allocation39_spill]] %s4019_s12 }
   0x9   :  { %4054 = sst [smem:[#allocation40_spill]] %s4023_s16 }
   0xa   :  { %4055 = sst [smem:[#allocation41_spill]] %s4025_s18 }
   0xb   :  { %4056 = sst [smem:[#allocation42_spill]] %s4026_s19 }
   0xc   :  { %4057 = sst [smem:[#allocation43_spill]] %s4027_s20 }
   0xd   :  { %25 = vsyncpa [#allocation4], 0 }
   0xe   :  { %26 = vsyncpa [#allocation7], 0 }
   0xf   :  { %27 = vsyncpa [#allocation10], 0 }
  0x10   :  { %28 = vsyncpa [#allocation5], 0  ;;  %s3450_s1 = smov 0   ;;  %s3452_s22 = smov 0  }
  0x11   :  { %s3454_s23 = smov 0   ;;  %s3456_s24 = smov 0  }
  0x12 LB: > { %4058 = sst [smem:[#allocation27_spill]] %s3310_s22  ;;  %s3469_s2 = sadd.s32 4294967295, %s3318_s24   ;;  %s3318_s24 = sphi %s3456_s24, %s4110_s24   ;;  %s3314_s23 = sphi %s3454_s23, %s4113_s23   ;;  %s3310_s22 = sphi %s3452_s22, %s4112_s22   ;;  %s3306_s1 = sphi %s3450_s1, %s4111_s1  }
  0x13   : > { %4059 = sst [smem:[#allocation28_spill]] %s3314_s23  ;;  %s3472_s25 = sadd.s32 1, %s3318_s24  }
  0x14   : > { %4060 = sst [smem:[#allocation29_spill]] %s3472_s25  ;;  %s148_s3 = ssub.s32 %s3318_s24, %s3472_s25 }
  0x15   : > { %s151_s26 = sadd.s32 1, %s3314_s23  ;;  %p149_p0 = scmp.eq.s32.totalorder %s148_s3, 0 }
  0x16   : > { %p158_p1 = scmp.ne.s32.totalorder %s3314_s23, %s3310_s22  ;;  %p159_p2 = scmp.eq.s32.totalorder %s3318_s24, 0 }
  0x17   : > { %p164_p3 = scmp.ne.s32.totalorder %s3310_s22, %s3306_s1  ;;  %p4028_p5 = scmp.eq.s32.totalorder %s3469_s2, 0 }
  0x18   : > { %s3482_s27 = scalar_select %p149_p0, %s3314_s23, %s151_s26  }
  0x19   : > { %p3484_p4 = por %p159_p2, %p158_p1  ;;  %p2456_p6 = scmp.ge.s32.totalorder %s3318_s24, 1 }
  0x1a   : > { %4061 = sst [smem:[#allocation30_spill]] %s3482_s27  ;;  %p540_p7 = scmp.lt.s32.totalorder %s3318_s24, 3 }
  0x1b   : > { %p3493_p8 = por %p4028_p5, %p164_p3  ;;  %s3320_s30 = smov [#allocation3]  }
  0x1c   : > { %p3498_p10 = pnand %p2456_p6, %p540_p7  ;;  %s552_s0 = sshll.u32 %s3320_s30, 4  ;;  %s553_s0 = int_to_ptr.vmem [resolvable:$true] %s552_s0 }
  0x1d   : > { %s4063_s4 = scalar_select %p3493_p8, 1, 0 }
  0x1e   : > { %s4065_s29 = scalar_select %p3498_p10, 1, 0 }
  0x1f   : > { %4064 = sst [smem:[#allocation31_spill]] %s4063_s4  ;;  %p2735_p11 = pneg %p3498_p10 }
  0x20   : > { %p2781_p13 = scmp.lt.s32.totalorder %s3318_s24, 2  ;;  %s627_s1 = sand.u32 1, %s3318_s24  }
  0x21   : > { %p3506_p12 = pnand %p2735_p11, %p4028_p5  ;;  %s3513_s3 = sand.u32 1, %s3314_s23  }
  0x22   : > { %p3517_p0 = pnand %p2781_p13, %p3484_p4  ;;  %s2897_s27 = scalar_lea.vmem %s553_s0, 256 }
  0x23   : > { %s4066_s21 = scalar_select %p3506_p12, 1, 0 }
  0x24   : > { %s4067_s26 = scalar_select %p3517_p0, 1, 0 }
  0x25   : > { %p3523_p1 = pneg %p3506_p12  ;;  %p2898_p2 = scmp.ne.s32.totalorder %s553_s0, %s2897_s27 }
  0x26   : > { %p2905_p7 = scmp.lt.s32.totalorder %s553_s0, %s553_s0  ;;  %p2906_p11 = scmp.lt.s32.totalorder %s2897_s27, %s2897_s27 }
  0x27   : > { %s4068_s30 = scalar_select %p3523_p1, 1, 0 }
  0x28   : > { %p2900_p3 = pnand %p2898_p2, %p3523_p1  ;;  %p2907_p9 = por %p2906_p11, %p2905_p7 }
  0x2a   : > { %p2901_p6 = pneg %p2900_p3 }
  0x2c   : > { %p2908_p5 = pnand %p2907_p9, %p2901_p6 }
  0x2e   : > { %2911 = shalt.err (!%p2908_p5)
}
  0x2f   : > { %s3321_s28 = smov 128   ;;  %s3322_s23 = smov 8  }
  0x30   : > { %s4069_s19 = sld [smem:[#allocation32_spill]]  ;;  %s3535_s18 = sshll.u32 %s3318_s24, 4 }
  0x31   : > { %s3541_s27 = scalar_lea.hbm %s4012_s5, %s3535_s18  ;;  %s630_s10 = scalar_lea.vmem [#allocation11], %s3513_s3 }
  0x32   : > { %s637_s6 = sshll.u32 %s630_s10, 4  ;;  %s3544_s4 = scalar_lea.sflag [#allocation4], %s627_s1  ;;  %s638_s6 = int_to_ptr.vmem [resolvable:$true] %s637_s6 }
  0x33   : > { %s2912_s22 = scalar_lea.hbm %s3541_s27, 16  ;;  %p3550_p5 = pneg %p3517_p0 }
  0x34   : > { %p2913_p4 = scmp.ne.s32.totalorder %s3541_s27, %s2912_s22  ;;  %s2917_s20 = scalar_lea.hbm %s4012_s5, 32 }
  0x35   : > { %p2918_p2 = scmp.lt.s32.totalorder %s3541_s27, %s4012_s5  ;;  %p2919_p3 = scmp.lt.s32.totalorder %s2917_s20, %s2912_s22 }
  0x36   : > { %2738 = dma.hbm_to_vmem [thread:$0]  (!%p3506_p12), %s4069_s19, 256, %s553_s0, [#allocation4], %s3321_s28, %s3321_s28, %s3322_s23  }
  0x37   : > { %s4070_s19 = scalar_select %p3550_p5, 1, 0 }
  0x38   : > { %p2915_p9 = pnand %p3550_p5, %p2913_p4  ;;  %p2920_p6 = por %p2919_p3, %p2918_p2 }
  0x3a   : > { %p2916_p13 = pneg %p2915_p9 }
  0x3c   : > { %p2921_p7 = pnand %p2920_p6, %p2916_p13 }
  0x3e   : > { %2924 = shalt.err (!%p2921_p7)
}
  0x3f   : > { %s2925_s24 = scalar_lea.vmem %s638_s6, 16  ;;  %s3323_s25 = smov [#allocation11]  }
  0x40   : > { %p2926_p11 = scmp.ne.s32.totalorder %s638_s6, %s2925_s24  ;;  %s2930_s0 = sshll.u32 %s3323_s25, 4  ;;  %s2931_s0 = int_to_ptr.vmem [resolvable:$false] %s2930_s0 }
  0x41   : > { %s2932_s1 = scalar_lea.vmem %s2931_s0, 32  ;;  %p2933_p4 = scmp.lt.s32.totalorder %s638_s6, %s2931_s0 }
  0x42   : > { %p2928_p8 = pnand %p2926_p11, %p3550_p5  ;;  %p2934_p9 = scmp.lt.s32.totalorder %s2932_s1, %s2925_s24 }
  0x44   : > { %p2929_p10 = pneg %p2928_p8  ;;  %p2935_p12 = por %p2934_p9, %p2933_p4 }
  0x46   : > { %p2936_p1 = pnand %p2935_p12, %p2929_p10 }
  0x48   : > { %2939 = shalt.err (!%p2936_p1)
}
  0x49   : > { %2754 = dma.hbm_to_vmem [thread:$0]  (!%p3517_p0), %s3541_s27, 16, %s638_s6, %s3544_s4  }
  0x4a   : > { %s660_s12 = scalar_lea.hbm %s4014_s7, %s3535_s18  ;;  %s655_s16 = scalar_lea.vmem [#allocation12], %s3513_s3 }
  0x4b   : > { %s662_s20 = sshll.u32 %s655_s16, 4  ;;  %s2940_s23 = scalar_lea.hbm %s660_s12, 16  ;;  %s663_s20 = int_to_ptr.vmem [resolvable:$true] %s662_s20 }
  0x4c   : > { %p2941_p8 = scmp.ne.s32.totalorder %s660_s12, %s2940_s23  ;;  %s2945_s25 = scalar_lea.hbm %s4014_s7, 32 }
  0x4d   : > { %p2946_p1 = scmp.lt.s32.totalorder %s660_s12, %s4014_s7  ;;  %p2947_p13 = scmp.lt.s32.totalorder %s2945_s25, %s2940_s23 }
  0x4e   : > { %p2943_p10 = pnand %p2941_p8, %p3550_p5 }
  0x4f   : > { %p2948_p2 = por %p2947_p13, %p2946_p1 }
  0x50   : > { %p2944_p12 = pneg %p2943_p10 }
  0x52   : > { %p2949_p3 = pnand %p2948_p2, %p2944_p12 }
  0x54   : > { %2952 = shalt.err (!%p2949_p3)
}
  0x55   : > { %s2953_s6 = scalar_lea.vmem %s663_s20, 16  ;;  %s3324_s27 = smov [#allocation12]  }
  0x56   : > { %p2954_p6 = scmp.ne.s32.totalorder %s663_s20, %s2953_s6  ;;  %s2958_s22 = sshll.u32 %s3324_s27, 4  ;;  %s2959_s22 = int_to_ptr.vmem [resolvable:$false] %s2958_s22 }
  0x57   : > { %s2960_s28 = scalar_lea.vmem %s2959_s22, 32  ;;  %p2961_p4 = scmp.lt.s32.totalorder %s663_s20, %s2959_s22 }
  0x58   : > { %p2956_p7 = pnand %p2954_p6, %p3550_p5  ;;  %p2962_p9 = scmp.lt.s32.totalorder %s2960_s28, %s2953_s6 }
  0x5a   : > { %p2957_p11 = pneg %p2956_p7  ;;  %p2963_p8 = por %p2962_p9, %p2961_p4 }
  0x5c   : > { %p2964_p10 = pnand %p2963_p8, %p2957_p11 }
  0x5e   : > { %2967 = shalt.err (!%p2964_p10)
}
  0x5f   : > { %2757 = dma.hbm_to_vmem [thread:$0]  (!%p3517_p0), %s660_s12, 16, %s663_s20, %s3544_s4  }
  0x60   : > { %s677_s10 = scalar_lea.hbm %s4015_s8, %s3535_s18  ;;  %s672_s24 = scalar_lea.vmem [#allocation13], %s3513_s3 }
  0x61   : > { %s679_s25 = sshll.u32 %s672_s24, 4  ;;  %s2968_s0 = scalar_lea.hbm %s677_s10, 16  ;;  %s680_s25 = int_to_ptr.vmem [resolvable:$true] %s679_s25 }
  0x62   : > { %p2969_p12 = scmp.ne.s32.totalorder %s677_s10, %s2968_s0  ;;  %s2973_s27 = scalar_lea.hbm %s4015_s8, 32 }
  0x63   : > { %p2974_p2 = scmp.lt.s32.totalorder %s677_s10, %s4015_s8  ;;  %p2975_p3 = scmp.lt.s32.totalorder %s2973_s27, %s2968_s0 }
  0x64   : > { %p2971_p1 = pnand %p2969_p12, %p3550_p5 }
  0x65   : > { %p2976_p6 = por %p2975_p3, %p2974_p2 }
  0x66   : > { %p2972_p13 = pneg %p2971_p1 }
  0x68   : > { %p2977_p7 = pnand %p2976_p6, %p2972_p13 }
  0x6a   : > { %2980 = shalt.err (!%p2977_p7)
}
  0x6b   : > { %s2981_s12 = scalar_lea.vmem %s680_s25, 16  ;;  %s3325_s20 = smov [#allocation13]  }
  0x6c   : > { %p2982_p11 = scmp.ne.s32.totalorder %s680_s25, %s2981_s12  ;;  %s2986_s16 = sshll.u32 %s3325_s20, 4  ;;  %s2987_s16 = int_to_ptr.vmem [resolvable:$false] %s2986_s16 }
  0x6d   : > { %s2988_s23 = scalar_lea.vmem %s2987_s16, 32  ;;  %p2989_p8 = scmp.lt.s32.totalorder %s680_s25, %s2987_s16 }
  0x6e   : > { %p2984_p4 = pnand %p2982_p11, %p3550_p5  ;;  %p2990_p10 = scmp.lt.s32.totalorder %s2988_s23, %s2981_s12 }
  0x70   : > { %p2985_p9 = pneg %p2984_p4  ;;  %p2991_p12 = por %p2990_p10, %p2989_p8 }
  0x72   : > { %p2992_p1 = pnand %p2991_p12, %p2985_p9 }
  0x74   : > { %2995 = shalt.err (!%p2992_p1)
}
  0x75   : > { %2760 = dma.hbm_to_vmem [thread:$0]  (!%p3517_p0), %s677_s10, 16, %s680_s25, %s3544_s4  }
  0x76   : > { %s694_s1 = scalar_lea.hbm %s4016_s9, %s3535_s18  ;;  %s689_s6 = scalar_lea.vmem [#allocation14], %s3513_s3 }
  0x77   : > { %s696_s27 = sshll.u32 %s689_s6, 4  ;;  %s2996_s22 = scalar_lea.hbm %s694_s1, 16  ;;  %s697_s27 = int_to_ptr.vmem [resolvable:$true] %s696_s27 }
  0x78   : > { %p2997_p13 = scmp.ne.s32.totalorder %s694_s1, %s2996_s22  ;;  %s3001_s20 = scalar_lea.hbm %s4016_s9, 32 }
  0x79   : > { %p3002_p6 = scmp.lt.s32.totalorder %s694_s1, %s4016_s9  ;;  %p3003_p7 = scmp.lt.s32.totalorder %s3001_s20, %s2996_s22 }
  0x7a   : > { %p2999_p2 = pnand %p2997_p13, %p3550_p5 }
  0x7b   : > { %p3004_p11 = por %p3003_p7, %p3002_p6 }
  0x7c   : > { %p3000_p3 = pneg %p2999_p2 }
  0x7e   : > { %p3005_p4 = pnand %p3004_p11, %p3000_p3 }
  0x80   : > { %3008 = shalt.err (!%p3005_p4)
}
  0x81   : > { %s3009_s10 = scalar_lea.vmem %s697_s27, 16  ;;  %s3326_s25 = smov [#allocation14]  }
  0x82   : > { %p3010_p9 = scmp.ne.s32.totalorder %s697_s27, %s3009_s10  ;;  %s3014_s24 = sshll.u32 %s3326_s25, 4  ;;  %s3015_s24 = int_to_ptr.vmem [resolvable:$false] %s3014_s24 }
  0x83   : > { %s3016_s0 = scalar_lea.vmem %s3015_s24, 32  ;;  %p3017_p12 = scmp.lt.s32.totalorder %s697_s27, %s3015_s24 }
  0x84   : > { %p3012_p8 = pnand %p3010_p9, %p3550_p5  ;;  %p3018_p1 = scmp.lt.s32.totalorder %s3016_s0, %s3009_s10 }
  0x86   : > { %p3013_p10 = pneg %p3012_p8  ;;  %p3019_p13 = por %p3018_p1, %p3017_p12 }
  0x88   : > { %p3020_p2 = pnand %p3019_p13, %p3013_p10 }
  0x8a   : > { %3023 = shalt.err (!%p3020_p2)
}
  0x8b   : > { %2763 = dma.hbm_to_vmem [thread:$0]  (!%p3517_p0), %s694_s1, 16, %s697_s27, %s3544_s4  }
  0x8c   : > { %s719_s28 = scalar_lea.hbm %s4018_s11, %s3535_s18  ;;  %s714_s12 = scalar_lea.vmem [#allocation15], %s3513_s3 }
  0x8d   : > { %s721_s20 = sshll.u32 %s714_s12, 4  ;;  %s3024_s16 = scalar_lea.hbm %s719_s28, 16  ;;  %s722_s20 = int_to_ptr.vmem [resolvable:$true] %s721_s20 }
  0x8e   : > { %p3025_p3 = scmp.ne.s32.totalorder %s719_s28, %s3024_s16  ;;  %s3029_s25 = scalar_lea.hbm %s4018_s11, 32 }
  0x8f   : > { %p3030_p11 = scmp.lt.s32.totalorder %s719_s28, %s4018_s11  ;;  %p3031_p4 = scmp.lt.s32.totalorder %s3029_s25, %s3024_s16 }
  0x90   : > { %p3027_p6 = pnand %p3025_p3, %p3550_p5 }
  0x91   : > { %p3032_p9 = por %p3031_p4, %p3030_p11 }
  0x92   : > { %p3028_p7 = pneg %p3027_p6 }
  0x94   : > { %p3033_p8 = pnand %p3032_p9, %p3028_p7 }
  0x96   : > { %3036 = shalt.err (!%p3033_p8)
}
  0x97   : > { %s3037_s1 = scalar_lea.vmem %s722_s20, 16  ;;  %s3327_s27 = smov [#allocation15]  }
  0x98   : > { %p3038_p10 = scmp.ne.s32.totalorder %s722_s20, %s3037_s1  ;;  %s3042_s6 = sshll.u32 %s3327_s27, 4  ;;  %s3043_s6 = int_to_ptr.vmem [resolvable:$false] %s3042_s6 }
  0x99   : > { %s3044_s22 = scalar_lea.vmem %s3043_s6, 32  ;;  %p3045_p13 = scmp.lt.s32.totalorder %s722_s20, %s3043_s6 }
  0x9a   : > { %p3040_p12 = pnand %p3038_p10, %p3550_p5  ;;  %p3046_p2 = scmp.lt.s32.totalorder %s3044_s22, %s3037_s1 }
  0x9c   : > { %p3041_p1 = pneg %p3040_p12  ;;  %p3047_p3 = por %p3046_p2, %p3045_p13 }
  0x9e   : > { %p3048_p6 = pnand %p3047_p3, %p3041_p1 }
  0xa0   : > { %3051 = shalt.err (!%p3048_p6)
}
  0xa1   : > { %2766 = dma.hbm_to_vmem [thread:$0]  (!%p3517_p0), %s719_s28, 16, %s722_s20, %s3544_s4  }
  0xa2   : > { %s3328_s12 = smov [#allocation6]   ;;  %s3645_s25 = scalar_lea.hbm %s4020_s13, %s3535_s18 }
  0xa3   : > { %s566_s16 = sshll.u32 %s3328_s12, 4  ;;  %p4071_p11 = scmp.ne.s32.totalorder %s4068_s30, 0  ;;  %s567_s16 = int_to_ptr.vmem [resolvable:$true] %s566_s16 }
  0xa4   : > { %s3063_s24 = scalar_lea.vmem %s567_s16, 32  ;;  %p3071_p8 = scmp.lt.s32.totalorder %s567_s16, %s567_s16 }
  0xa5   : > { %p3064_p7 = scmp.ne.s32.totalorder %s567_s16, %s3063_s24  ;;  %p3072_p10 = scmp.lt.s32.totalorder %s3063_s24, %s3063_s24 }
  0xa7   : > { %p3066_p4 = pnand %p3064_p7, %p4071_p11  ;;  %p3073_p12 = por %p3072_p10, %p3071_p8 }
  0xa9   : > { %p3067_p9 = pneg %p3066_p4 }
  0xab   : > { %p3074_p1 = pnand %p3073_p12, %p3067_p9 }
  0xad   : > { %3077 = shalt.err (!%p3074_p1)
}
  0xae   : > { %p4072_p13 = scmp.ne.s32.totalorder %s4066_s21, 0  ;;  %s4073_s0 = sld [smem:[#allocation33_spill]] }
  0xaf   : > { %s739_s1 = scalar_lea.vmem [#allocation16], %s3513_s3  ;;  %s3329_s6 = smov [#allocation8]  }
  0xb0   : > { %s746_s27 = sshll.u32 %s739_s1, 4  ;;  %s577_s22 = sshll.u32 %s3329_s6, 4  ;;  %s747_s27 = int_to_ptr.vmem [resolvable:$true] %s746_s27  ;;  %s578_s22 = int_to_ptr.vmem [resolvable:$true] %s577_s22 }
  0xb1   : > { %s3078_s12 = scalar_lea.hbm %s3645_s25, 16  ;;  %s3083_s24 = scalar_lea.hbm %s4020_s13, 32 }
  0xb2   : > { %p3079_p2 = scmp.ne.s32.totalorder %s3645_s25, %s3078_s12  ;;  %p3084_p7 = scmp.lt.s32.totalorder %s3645_s25, %s4020_s13 }
  0xb3   : > { %p3085_p4 = scmp.lt.s32.totalorder %s3083_s24, %s3078_s12 }
  0xb4   : > { %2741 = dma.hbm_to_vmem [thread:$0]  (!%p4072_p13), %s4073_s0, 32, %s567_s16, [#allocation7]  }
  0xb5   : > { %p3081_p3 = pnand %p3079_p2, %p3550_p5  ;;  %p3086_p9 = por %p3085_p4, %p3084_p7 }
  0xb7   : > { %p3082_p6 = pneg %p3081_p3 }
  0xb9   : > { %p3087_p8 = pnand %p3086_p9, %p3082_p6 }
  0xbb   : > { %3090 = shalt.err (!%p3087_p8)
}
  0xbc   : > { %s3091_s16 = scalar_lea.vmem %s747_s27, 16  ;;  %s3330_s0 = smov [#allocation16]  }
  0xbd   : > { %p3092_p10 = scmp.ne.s32.totalorder %s747_s27, %s3091_s16  ;;  %s3096_s1 = sshll.u32 %s3330_s0, 4  ;;  %s3097_s1 = int_to_ptr.vmem [resolvable:$false] %s3096_s1 }
  0xbe   : > { %s3098_s6 = scalar_lea.vmem %s3097_s1, 32  ;;  %p3099_p2 = scmp.lt.s32.totalorder %s747_s27, %s3097_s1 }
  0xbf   : > { %p3094_p12 = pnand %p3092_p10, %p3550_p5  ;;  %p3100_p3 = scmp.lt.s32.totalorder %s3098_s6, %s3091_s16 }
  0xc1   : > { %p3095_p1 = pneg %p3094_p12  ;;  %p3101_p13 = por %p3100_p3, %p3099_p2 }
  0xc3   : > { %p3102_p11 = pnand %p3101_p13, %p3095_p1 }
  0xc5   : > { %3105 = shalt.err (!%p3102_p11)
}
  0xc6   : > { %2769 = dma.hbm_to_vmem [thread:$0]  (!%p3517_p0), %s3645_s25, 16, %s747_s27, %s3544_s4  }
  0xc7   : > { %s3117_s12 = scalar_lea.vmem %s578_s22, 16  ;;  %p4074_p7 = scmp.ne.s32.totalorder %s4068_s30, 0 }
  0xc8   : > { %p3118_p6 = scmp.ne.s32.totalorder %s578_s22, %s3117_s12  ;;  %s3124_s23 = scalar_lea.vmem %s578_s22, 32 }
  0xc9   : > { %p3125_p8 = scmp.lt.s32.totalorder %s578_s22, %s578_s22  ;;  %p3126_p10 = scmp.lt.s32.totalorder %s3124_s23, %s3117_s12 }
  0xca   : > { %p3120_p4 = pnand %p3118_p6, %p4074_p7 }
  0xcb   : > { %p3127_p12 = por %p3126_p10, %p3125_p8 }
  0xcc   : > { %p3121_p9 = pneg %p3120_p4 }
  0xce   : > { %p3128_p5 = pnand %p3127_p12, %p3121_p9 }
  0xd0   : > { %3131 = shalt.err (!%p3128_p5)
}
  0xd1   : > { %p4075_p11 = scmp.ne.s32.totalorder %s4066_s21, 0  ;;  %s4076_s28 = sld [smem:[#allocation34_spill]] }
  0xd2   : > { %s761_s20 = scalar_lea.hbm %s4021_s14, %s3535_s18  ;;  %s756_s16 = scalar_lea.vmem [#allocation17], %s3513_s3 }
  0xd3   : > { %s763_s0 = sshll.u32 %s756_s16, 4  ;;  %s3132_s1 = scalar_lea.hbm %s761_s20, 16  ;;  %s764_s0 = int_to_ptr.vmem [resolvable:$true] %s763_s0 }
  0xd4   : > { %p3133_p13 = scmp.ne.s32.totalorder %s761_s20, %s3132_s1  ;;  %p4077_p1 = scmp.ne.s32.totalorder %s4070_s19, 0 }
  0xd5   : > { %s3137_s23 = scalar_lea.hbm %s4021_s14, 32  ;;  %p3138_p3 = scmp.lt.s32.totalorder %s761_s20, %s4021_s14 }
  0xd6   : > { %p3135_p5 = pnand %p3133_p13, %p4077_p1  ;;  %p3139_p6 = scmp.lt.s32.totalorder %s3137_s23, %s3132_s1 }
  0xd7   : > { %2744 = dma.hbm_to_vmem [thread:$0]  (!%p4075_p11), %s4076_s28, 16, %s578_s22, [#allocation7]  }
  0xd8   : > { %p3136_p2 = pneg %p3135_p5  ;;  %p3140_p4 = por %p3139_p6, %p3138_p3 }
  0xda   : > { %p3141_p9 = pnand %p3140_p4, %p3136_p2 }
  0xdc   : > { %3144 = shalt.err (!%p3141_p9)
}
  0xdd   : > { %s3145_s22 = scalar_lea.vmem %s764_s0, 16  ;;  %s3331_s28 = smov [#allocation17]  }
  0xde   : > { %p3146_p8 = scmp.ne.s32.totalorder %s764_s0, %s3145_s22  ;;  %s3150_s25 = sshll.u32 %s3331_s28, 4  ;;  %s3151_s25 = int_to_ptr.vmem [resolvable:$false] %s3150_s25 }
  0xdf   : > { %s3152_s27 = scalar_lea.vmem %s3151_s25, 32  ;;  %p3153_p13 = scmp.lt.s32.totalorder %s764_s0, %s3151_s25 }
  0xe0   : > { %p3148_p10 = pnand %p3146_p8, %p4077_p1  ;;  %p3154_p5 = scmp.lt.s32.totalorder %s3152_s27, %s3145_s22 }
  0xe2   : > { %p3149_p12 = pneg %p3148_p10  ;;  %p3155_p11 = por %p3154_p5, %p3153_p13 }
  0xe4   : > { %p3156_p7 = pnand %p3155_p11, %p3149_p12 }
  0xe6   : > { %3159 = shalt.err (!%p3156_p7)
}
  0xe7   : > { %2772 = dma.hbm_to_vmem [thread:$0]  (!%p3517_p0), %s761_s20, 16, %s764_s0, %s3544_s4  }
  0xe8   : > { %s3332_s16 = smov [#allocation9]   ;;  %s3333_s6 = smov [#allocation19]  }
  0xe9   : > { %s588_s1 = sshll.u32 %s3332_s16, 4  ;;  %s602_s12 = sshll.u32 %s3333_s6, 4  ;;  %s589_s1 = int_to_ptr.vmem [resolvable:$true] %s588_s1  ;;  %s603_s12 = int_to_ptr.vmem [resolvable:$true] %s602_s12 }
  0xea   : > { %s3171_s23 = scalar_lea.vmem %s589_s1, 16  ;;  %p4078_p3 = scmp.ne.s32.totalorder %s4068_s30, 0 }
  0xeb   : > { %p3172_p2 = scmp.ne.s32.totalorder %s589_s1, %s3171_s23  ;;  %s3178_s10 = scalar_lea.vmem %s589_s1, 32 }
  0xec   : > { %p3179_p9 = scmp.lt.s32.totalorder %s589_s1, %s589_s1  ;;  %p3180_p8 = scmp.lt.s32.totalorder %s3178_s10, %s3171_s23 }
  0xed   : > { %p3174_p6 = pnand %p3172_p2, %p4078_p3 }
  0xee   : > { %p3181_p11 = por %p3180_p8, %p3179_p9 }
  0xef   : > { %p3175_p4 = pneg %p3174_p6 }
  0xf1   : > { %p3182_p7 = pnand %p3181_p11, %p3175_p4 }
  0xf3   : > { %3185 = shalt.err (!%p3182_p7)
}
  0xf4   : > { %p4079_p10 = scmp.ne.s32.totalorder %s4066_s21, 0  ;;  %s4080_s0 = sld [smem:[#allocation35_spill]] }
  0xf5   : > { %s3197_s22 = scalar_lea.vmem %s603_s12, 16  ;;  %s3204_s28 = scalar_lea.vmem %s603_s12, 32 }
  0xf6   : > { %p3198_p12 = scmp.ne.s32.totalorder %s603_s12, %s3197_s22  ;;  %p3205_p2 = scmp.lt.s32.totalorder %s603_s12, %s603_s12 }
  0xf7   : > { %p3206_p6 = scmp.lt.s32.totalorder %s3204_s28, %s3197_s22 }
  0xf8   : > { %p3200_p13 = pnand %p3198_p12, %p4078_p3 }
  0xf9   : > { %p3207_p0 = por %p3206_p6, %p3205_p2 }
  0xfa   : > { %2747 = dma.hbm_to_vmem [thread:$0]  (!%p4079_p10), %s4080_s0, 16, %s589_s1, [#allocation10]  }
  0xfb   : > { %p3201_p5 = pneg %p3200_p13 }
  0xfd   : > { %p3208_p9 = pnand %p3207_p0, %p3201_p5 }
  0xff   : > { %3211 = shalt.err (!%p3208_p9)
}
 0x100   : > { %2750 = dma.hbm_to_vmem [thread:$0]  (!%p4079_p10), %s4024_s17, 16, %s603_s12, [#allocation7]  }
 0x101   : > { %s778_s30 = scalar_lea.hbm %s4022_s15, %s3535_s18  ;;  %s773_s6 = scalar_lea.vmem [#allocation18], %s3513_s3 }
 0x102   : > { %s780_s23 = sshll.u32 %s773_s6, 4  ;;  %s3212_s10 = scalar_lea.hbm %s778_s30, 16  ;;  %s781_s23 = int_to_ptr.vmem [resolvable:$true] %s780_s23 }
 0x103   : > { %p3213_p3 = scmp.ne.s32.totalorder %s778_s30, %s3212_s10  ;;  %s3217_s20 = scalar_lea.hbm %s4022_s15, 32 }
 0x104   : > { %p3218_p8 = scmp.lt.s32.totalorder %s778_s30, %s4022_s15  ;;  %p3219_p11 = scmp.lt.s32.totalorder %s3217_s20, %s3212_s10 }
 0x105   : > { %p3215_p0 = pnand %p3213_p3, %p4077_p1 }
 0x106   : > { %p3220_p7 = por %p3219_p11, %p3218_p8 }
 0x107   : > { %p3216_p4 = pneg %p3215_p0 }
 0x109   : > { %p3221_p10 = pnand %p3220_p7, %p3216_p4 }
 0x10b   : > { %3224 = shalt.err (!%p3221_p10)
}
 0x10c   : > { %s3225_s18 = scalar_lea.vmem %s781_s23, 16  ;;  %s3334_s3 = smov [#allocation18]  }
 0x10d   : > { %p3226_p12 = scmp.ne.s32.totalorder %s781_s23, %s3225_s18  ;;  %s3230_s12 = sshll.u32 %s3334_s3, 4  ;;  %s3231_s12 = int_to_ptr.vmem [resolvable:$false] %s3230_s12 }
 0x10e   : > { %s3232_s28 = scalar_lea.vmem %s3231_s12, 32  ;;  %p3233_p2 = scmp.lt.s32.totalorder %s781_s23, %s3231_s12 }
 0x10f   : > { %p3228_p13 = pnand %p3226_p12, %p4077_p1  ;;  %p3234_p6 = scmp.lt.s32.totalorder %s3232_s28, %s3225_s18 }
 0x111   : > { %p3229_p5 = pneg %p3228_p13  ;;  %p3235_p9 = por %p3234_p6, %p3233_p2 }
 0x113   : > { %p3236_p3 = pnand %p3235_p9, %p3229_p5 }
 0x115   : > { %3239 = shalt.err (!%p3236_p3)
}
 0x116   : > { %p4081_p0 = scmp.ne.s32.totalorder %s4067_s26, 0  ;;  %p4082_p4 = scmp.ne.s32.totalorder %s4065_s29, 0 }
 0x117   : > { %p4083_p8 = scmp.eq.s32.totalorder (!%p4082_p4), %s3469_s2, 0 }
 0x118   : > { %2775 = dma.hbm_to_vmem [thread:$0]  (!%p4081_p0), %s778_s30, 16, %s781_s23, %s3544_s4  }
 0x119   : > { %789 = sbr.rel (%p4082_p4) target bundleno = 4088 (0xff8), region = 100 }
 0x11e   : > { %3281 = dma.done.wait (%p4083_p8), [#allocation4], 256   ;;  %p4084_p1 = pmov %p4083_p8 }
 0x120   : > { %3283 = vsyncadd (%p4084_p1), [#allocation4], 4294967040  ;;  %p4085_p11 = pmov %p4084_p1 }
 0x121   : > { %p4086_p7 = pmov %p4084_p1 }
 0x122   : > { %3285 = dma.done.wait (%p4085_p11), [#allocation7], 48  }
 0x123   : > { %3287 = vsyncadd (%p4086_p7), [#allocation7], 4294967248  ;;  %p4087_p10 = pmov %p4084_p1 }
 0x124   : > { %p4088_p12 = pmov %p4084_p1 }
 0x125   : > { %3289 = dma.done.wait (%p4087_p10), [#allocation10], 16  }
 0x126   : > { %3291 = vsyncadd (%p4088_p12), [#allocation10], 4294967280  ;;  %s4089_s4 = sld [smem:[#allocation27_spill]]  ;;  %s807_s26 = sand.u32 1, %s3469_s2  }
 0x127   : > { %s4090_s29 = sld [smem:[#allocation31_spill]]  ;;  %s808_s25 = scalar_lea.sflag [#allocation4], %s807_s26 }
 0x12c   : > { %s3745_s19 = sand.u32 1, %s4089_s4  }
 0x12d   : > { %s810_s27 = scalar_lea.vmem [#allocation11], %s3745_s19  ;;  %p4091_p13 = scmp.ne.s32.totalorder %s4090_s29, 0 }
 0x12f   : > { %3293 = dma.done.wait (%p4091_p13), %s808_s25, 128  }
 0x130   : > { %3295 = vsyncadd (%p4091_p13), %s808_s25, 4294967168  ;;  %p4092_p5 = pmov %p4084_p1 }
 0x131   : > { %p4093_p2 = pmov %p4084_p1 }
 0x132   : > { %3297 = dma.done.wait (%p4092_p5), [#allocation7], 16  }
 0x133   : > { %3299 = vsyncadd (%p4093_p2), [#allocation7], 4294967280  ;;  %p969_p6 = scmp.lt.s32.totalorder %s3469_s2, 1  ;;  %s4094_s3 = sld [smem:[#allocation36_spill]] }
 0x134   : > { %s4095_s29 = sld [smem:[#allocation37_spill]]  ;;  %p4098_p9 = scmp.ne.s32.totalorder %s3469_s2, 0 }
 0x135   : > { %s970_s24 = scalar_select %p969_p6, %s3469_s2, 1 }
 0x136   : > { %s4096_s10 = sld [smem:[#allocation38_spill]] }
 0x137   : > { %s2534_s20 = sshll.u32 %s970_s24, 4  ;;  %s2537_s0 = sshll.u32 %s970_s24, 5 }
 0x138   : > { %s4097_s1 = sld [smem:[#allocation39_spill]] }
 0x139   : > { %s3768_s12 = scalar_lea.vmem %s4094_s3, %s2534_s20 }
 0x13a   : > { %s3773_s26 = scalar_lea.vmem %s4095_s29, %s2534_s20  ;;  %993 = sbr.rel (%p4098_p9) target bundleno = 633 (0x279), region = 156 }
 0x13c   : > { %s3778_s23 = scalar_lea.vmem %s4096_s10, %s2534_s20 }
 0x13e   : > { %s3783_s16 = scalar_lea.vmem %s4097_s1, %s2537_s0 }
 0x13f   : > { %v994_v0 = vld [vmem:[#allocation3] sm:$0xff]  ;;  %vm998_vm0 = vcmask 261120   ;;  %v995_v1 = vld [vmem:[#allocation3 + $0x8] sm:$0xff]  ;;  %v2486_v21 = vld [vmem:[#allocation8] ss:$0 sm:$0xff] }
 0x140   : > { %v999_v2 = vsel %vm998_vm0, %v994_v0, 0.0  ;;  %v1002_v3 = vsel %vm998_vm0, %v995_v1, 0.0  ;;  %v2487_v23 = vld [vmem:[#allocation9] ss:$0 sm:$0xff] }
 0x141   : > { %1000 = vadd.xlane.f32.xlu0 %v999_v2 }
 0x145   : > { %1003 = vadd.xlane.f32.xlu0 %v1002_v3 }
 0x1ca   : > { %v1001_v4 = vpop.xlane.xlu0 %1000 }
 0x1cb   : > { %v1006_v5 = vmul.f32 0.03125, %v1001_v4 }
 0x1cd   : > { %v1008_v6 = vsub.f32 %v994_v0, %v1006_v5 }
 0x1ce   : > { %v1004_v7 = vpop.xlane.xlu0 %1003 }
 0x1cf   : > { %v1007_v8 = vmul.f32 0.03125, %v1004_v7  ;;  %v1010_v9 = vmul.f32 %v1008_v6, %v1008_v6 }
 0x1d1   : > { %v1009_v10 = vsub.f32 %v995_v1, %v1007_v8  ;;  %v1012_v11 = vsel %vm998_vm0, %v1010_v9, 0.0 }
 0x1d2   : > { %1013 = vadd.xlane.f32.xlu1 %v1012_v11 }
 0x1d3   : > { %v1011_v12 = vmul.f32 %v1009_v10, %v1009_v10 }
 0x1d5   : > { %v1015_v13 = vsel %vm998_vm0, %v1011_v12, 0.0 }
 0x1d6   : > { %1016 = vadd.xlane.f32.xlu1 %v1015_v13 }
 0x25b   : > { %v1014_v14 = vpop.xlane.xlu1 %1013 }
 0x25c   : > { %v1018_v15 = vmul.f32 0.03125, %v1014_v14 }
 0x25e   : > { %v1020_v16 = vadd.f32 1e-12, %v1018_v15 }
 0x25f   : > { %v1017_v17 = vpop.xlane.xlu1 %1016 }
 0x260   : > { %2838 = vrsqrt.f32 %v1020_v16  ;;  %v1019_v18 = vmul.f32 0.03125, %v1017_v17 }
 0x262   : > { %v1021_v19 = vadd.f32 1e-12, %v1019_v18 }
 0x264   : > { %2840 = vrsqrt.f32 %v1021_v19 }
 0x26d   : > { %v2839_v20 = vpop.eup %2838 }
 0x26e   : > { %v1024_v22 = vmul.f32 %v2839_v20, %v1008_v6 }
 0x270   : > { %v1032_v24 = vmul.f32 %v2486_v21, %v1024_v22 }
 0x271   : > { %v2841_v25 = vpop.eup %2840 }
 0x272   : > { %v1040_v26 = vadd.f32 %v2487_v23, %v1032_v24  ;;  %v1025_v27 = vmul.f32 %v2841_v25, %v1009_v10 }
 0x274   : > { %1042 = vst.msk [vmem:[#allocation2] sm:$0xff] %vm998_vm0, %v1040_v26  ;;  %v1033_v28 = vmul.f32 %v2486_v21, %v1025_v27 }
 0x276   : > { %v1041_v29 = vadd.f32 %v2487_v23, %v1033_v28 }
 0x278   : > { %1043 = vst.msk [vmem:[#allocation2 + $0x8] sm:$0xff] %vm998_vm0, %v1041_v29 }
 0x279 PF: > { %v2842_v30 = vld [vmem:[%s3768_s12 + $0x8] sm:$0xff]   ;;  %v3335_v31 = vmov 0.0   ;;  %v2843_v32 = vld [vmem:[%s3768_s12] sm:$0xff]   ;;  %vm3336_vm1 = vmmov 0   ;;  %vm1070_vm2 = vcmask 261120   ;;  %s3337_s1 = smov 112   ;;  %v1172_v49 = vlaneseq }
 0x27a   : > { %2579 = vmatprep.subr.bf16.mxu1 %v3335_v31  ;;  %2593 = vmatprep.subr.bf16.mxu0 %v3335_v31  ;;  %v2488_v36 = vld [vmem:[%s810_s27] ss:$0 sm:$0xff]  ;;  %s3338_s30 = smov 96   ;;  %s3339_s6 = smov 80   ;;  %vm1124_vm3 = vcmask 130048   ;;  %vm1177_vm4 = vcmask 64512  }
 0x27b   : > { %2580 = vmatpush3.bf16.msra.mxu1 %v2842_v30  ;;  %2583 = vmatprep.mubr.msk.bf16.mxu1 %vm3336_vm1, %v3335_v31  ;;  %v3799_v33 = vld [vmem:[#allocation2] sm:$0xff]  ;;  %v3833_v50 = vshrl.u32 %v1172_v49, 7  ;;  %s3340_s27 = smov 64   ;;  %s3341_s10 = smov 48   ;;  %vm1195_vm5 = vcmask 1043456   ;;  %v2845_v28 = vld [vmem:[%s3773_s26 + $0x8] sm:$0xff]  }
 0x27c   : > { %2581 = vmatprep.subr.bf16.mxu1 %v3335_v31  ;;  %2595 = vmatprep.mubr.msk.bf16.mxu0 %vm3336_vm1, %v3335_v31  ;;  %v3836_v52 = vld [vmem:[#allocation6] sm:$0x3]  ;;  %s4099_s21 = scalar_lea.vmem [#allocation12], %s3745_s19  ;;  %s4100_s24 = scalar_lea.vmem [#allocation13], %s3745_s19  ;;  %vm1949_vm6 = vcmask 523264  }
 0x27d   : > { %v1174_v51 = vsub.s32 0, %v3833_v50  ;;  %v3866_v27 = vld [vmem:[%s3773_s26] sm:$0xff]   ;;  %s4102_s20 = scalar_lea.vmem [#allocation15], %s3745_s19  ;;  %s4104_s0 = scalar_lea.vmem [#allocation17], %s3745_s19 }
 0x27e   : > { %s4105_s22 = scalar_lea.vmem [#allocation18], %s3745_s19  ;;  %p2521_p3 = scmp.ne.s32.totalorder %s3469_s2, 1 }
 0x27f   : > { %v3801_v34 = vld [vmem:[#allocation2 + $0x8] sm:$0xff]  ;;  %2582 = vmatpush3.bf16.msra.mxu1 %v2843_v32  ;;  %v1175_v53 = vrot.slane %v3836_v52, %v1174_v51  ;;  %s4106_s12 = sld [smem:[#allocation40_spill]] (!%p2521_p3) }
 0x280   : > { %v1051_v35 = vpack.c.bf16 %v3801_v34, %v3799_v33  ;;  %2587 = vmatprep.subr.bf16.mxu1 %v3335_v31  ;;  %s4107_s26 = sld [smem:[#allocation41_spill]] (!%p2521_p3) }
 0x282   : > { %2584 = vmatmul.mubr.msk.bf16.vlgmr.msra.gmra.mxu1 %vm1070_vm2, %v1051_v35 }
 0x283   : > { %2589 = vmatprep.mubr.msk.bf16.mxu1 %vm3336_vm1, %v3335_v31 }
 0x342   : > { %v1108_v37 = vpop.f32.mrf.mxu1 }
 0x343   : > { %v1109_v38 = vadd.f32 %v2488_v36, %v1108_v37 }
 0x344   : > { %v2585_v39 = vpop.f32.mrf.mxu1 }
 0x345   : > { %v3814_v40 = vpack.c.bf16 %v1109_v38, %v1109_v38 }
 0x346   : > { %v1111_v41 = vpop.f32.mrf.mxu1 }
 0x347   : > { %v1112_v42 = vadd.f32 %v2488_v36, %v1111_v41  ;;  %1240 = vrot.lane.b32.xlu1 %v3814_v40, %s3337_s1  ;;  %1122 = vrot.lane.b32.xlu0 %v3814_v40, %s3338_s30 }
 0x348   : > { %v2586_v43 = vpop.f32.mrf.mxu1 }
 0x349   : > { %v3845_v14 = vpack.c.bf16 %v1112_v42, %v1112_v42 }
 0x34b   : > { %1242 = vrot.lane.b32.xlu0 %v3814_v40, %s3339_s6 }
 0x3b9   : > { %v1123_v44 = vpop.permute.xlu0 %1122  ;;  %v1241_v48 = vpop.permute.xlu1 %1240 }
 0x3ba   : > { %v1129_v45 = vsel %vm1124_vm3, %v1123_v44, 0 }
 0x3bb   : > { %2588 = vmatpush3.bf16.xpose.msra.mxu1 %v1129_v45 }
 0x3bc   : > { %2599 = vmatprep.subr.bf16.mxu1 %v3335_v31 }
 0x3bd   : > { %v1243_v46 = vpop.permute.xlu0 %1242 }
 0x3be   : > { %v1248_v47 = vsel %vm1124_vm3, %v1243_v46, 0 }
 0x3c2   : > { %2590 = vmatmul.mubr.msk.bf16.vlgmr.msra.gmra.mxu1 %vm1124_vm3, %v3814_v40 }
 0x3c3   : > { %2600 = vmatpush3.bf16.xpose.msra.mxu1 %v1248_v47  ;;  %2601 = vmatprep.mubr.msk.bf16.mxu1 %vm3336_vm1, %v3335_v31 }
 0x3c4   : > { %2611 = vmatprep.subr.bf16.mxu1 %v3335_v31 }
 0x3ca   : > { %2602 = vmatmul.mubr.msk.bf16.vlgmr.msra.gmra.mxu1 %vm1124_vm3, %v1241_v48 }
 0x3cb   : > { %2613 = vmatprep.mubr.msk.bf16.mxu1 %vm3336_vm1, %v3335_v31  ;;  %2612 = vmatpush3.bf16.msra.mxu1 %v2845_v28 }
 0x3cc   : > { %2623 = vmatprep.subr.bf16.mxu1 %v3335_v31 }
 0x482   : > { %v1165_v54 = vpop.f32.mrf.mxu1 }
 0x483   : > { %v1171_v55 = vmul.f32 0.25, %v1165_v54 }
 0x484   : > { %v2591_v56 = vpop.f32.mrf.mxu1 }
 0x485   : > { %v1176_v57 = vadd.f32 %v1175_v53, %v1171_v55  ;;  %v1504_v56 = vsub.s32 1, %v3833_v50 }
 0x486   : > { %v1168_v58 = vpop.f32.mrf.mxu1 }
 0x487   : > { %v1178_v59 = vsel %vm1177_vm4, %v1176_v57, -inf }
 0x488   : > { %1179 = vmax.xlane.f32.xlu1 %v1178_v59  ;;  %v2592_v60 = vpop.f32.mrf.mxu1  ;;  %v1505_v59 = vrot.slane %v3836_v52, %v1504_v56  ;;  %v3898_v52 = vld [vmem:[%s4099_s21] ss:$0 sm:$0xff] }
 0x48a   : > { %v1284_v61 = vpop.f32.mrf.mxu1 }
 0x48b   : > { %v1290_v62 = vmul.f32 0.25, %v1284_v61 }
 0x48c   : > { %v2603_v63 = vpop.f32.mrf.mxu1 }
 0x48d   : > { %v1291_v0 = vadd.f32 %v1290_v62, %v1175_v53 }
 0x48e   : > { %v1287_v1 = vpop.f32.mrf.mxu1 }
 0x48f   : > { %v1292_v2 = vsel %vm1177_vm4, %v1291_v0, -inf }
 0x490   : > { %1293 = vmax.xlane.f32.xlu0 %v1292_v2  ;;  %v2604_v3 = vpop.f32.mrf.mxu1 }
 0x511   : > { %v1180_v4 = vpop.xlane.xlu1 %1179 }
 0x512   : > { %v1181_v5 = vsub.f32 %v1176_v57, %v1180_v4 }
 0x514   : > { %v1182_v6 = vmul.f32 1.442695, %v1181_v5 }
 0x516   : > { %2852 = vpow2.f32 %v1182_v6 }
 0x519   : > { %v1294_v7 = vpop.xlane.xlu0 %1293 }
 0x51a   : > { %v1295_v8 = vsub.f32 %v1291_v0, %v1294_v7 }
 0x51c   : > { %v1296_v9 = vmul.f32 1.442695, %v1295_v8 }
 0x51e   : > { %2854 = vpow2.f32 %v1296_v9 }
 0x523   : > { %v2853_v10 = vpop.eup %2852 }
 0x524   : > { %v1184_v11 = vsel %vm1177_vm4, %v2853_v10, 0.0 }
 0x525   : > { %1185 = vadd.xlane.f32.xlu0 %v1184_v11 }
 0x52b   : > { %v2855_v12 = vpop.eup %2854 }
 0x52c   : > { %v1298_v13 = vsel %vm1177_vm4, %v2855_v12, 0.0 }
 0x52d   : > { %1299 = vadd.xlane.f32.xlu1 %v1298_v13 }
 0x53b   : > { %1190 = vrot.lane.b32.xlu0 %v3814_v40, %s3340_s27 }
 0x53e   : > { %1304 = vrot.lane.b32.xlu1 %v3814_v40, %s3341_s10 }
 0x53f   : > { %1570 = vrot.lane.b32.xlu0 %v3845_v14, %s3339_s6 }
 0x542   : > { %1453 = vrot.lane.b32.xlu1 %v3845_v14, %s3338_s30 }
 0x546   : > { %1568 = vrot.lane.b32.xlu1 %v3845_v14, %s3337_s1 }
 0x5ae   : > { %v1186_v15 = vpop.xlane.xlu0 %1185 }
 0x5af   : > { %2856 = vrcp.f32 %v1186_v15 }
 0x5b2   : > { %v1191_v16 = vpop.permute.xlu0 %1190 }
 0x5b3   : > { %v1197_v17 = vsel %vm1195_vm5, %v1191_v16, 0 }
 0x5b4   : > { %2594 = vmatpush3.bf16.msra.mxu0 %v1197_v17 }
 0x5b5   : > { %2605 = vmatprep.subr.bf16.mxu0 %v3335_v31 }
 0x5b6   : > { %v1300_v18 = vpop.xlane.xlu1 %1299  ;;  %v1571_v44 = vpop.permute.xlu0 %1570 }
 0x5b7   : > { %2858 = vrcp.f32 %v1300_v18  ;;  %v1576_v45 = vsel %vm1124_vm3, %v1571_v44, 0 }
 0x5ba   : > { %v1305_v21 = vpop.permute.xlu1 %1304 }
 0x5bb   : > { %v1310_v23 = vsel %vm1195_vm5, %v1305_v21, 0 }
 0x5bc   : > { %v2857_v19 = vpop.eup %2856 }
 0x5bd   : > { %v1188_v20 = vmul.f32 %v2857_v19, %v2853_v10 }
 0x5be   : > { %v1454_v37 = vpop.permute.xlu1 %1453 }
 0x5bf   : > { %v1189_v22 = vpack.c.bf16 %v1188_v20, %v1188_v20  ;;  %v1459_v41 = vsel %vm1124_vm3, %v1454_v37, 0 }
 0x5c1   : > { %2596 = vmatmul.mubr.msk.bf16.vlgmr.msra.gmra.mxu0 %vm1177_vm4, %v1189_v22 }
 0x5c2   : > { %2606 = vmatpush3.bf16.msra.mxu0 %v1310_v23  ;;  %2607 = vmatprep.mubr.msk.bf16.mxu0 %vm3336_vm1, %v3335_v31  ;;  %v1569_v46 = vpop.permute.xlu1 %1568 }
 0x5c3   : > { %2617 = vmatprep.subr.bf16.mxu0 %v3335_v31 }
 0x5c4   : > { %v2859_v24 = vpop.eup %2858 }
 0x5c5   : > { %v1302_v25 = vmul.f32 %v2859_v24, %v2855_v12 }
 0x5c7   : > { %v1303_v26 = vpack.c.bf16 %v1302_v25, %v1302_v25 }
 0x5c9   : > { %2608 = vmatmul.mubr.msk.bf16.vlgmr.msra.gmra.mxu0 %vm1177_vm4, %v1303_v26 }
 0x5ca   : > { %2619 = vmatprep.mubr.msk.bf16.mxu0 %vm3336_vm1, %v3335_v31  ;;  %2618 = vmatpush3.bf16.msra.mxu0 %v3866_v27 }
 0x5cb   : > { %2629 = vmatprep.subr.bf16.mxu0 %v3335_v31 }
 0x681   : > { %v1233_v29 = vpop.f32.mrf.mxu0 }
 0x682   : > { %v1239_v30 = vpack.c.bf16 %v1233_v29, %v1233_v29 }
 0x683   : > { %v2597_v32 = vpop.f32.mrf.mxu0 }
 0x684   : > { %2620 = vmatmul.mubr.msk.bf16.vlgmr.msra.gmra.mxu0 %vm1124_vm3, %v1239_v30 }
 0x685   : > { %v1236_v35 = vpop.f32.mrf.mxu0  ;;  %2631 = vmatprep.mubr.msk.bf16.mxu0 %vm3336_vm1, %v3335_v31 }
 0x687   : > { %v2598_v36 = vpop.f32.mrf.mxu0 }
 0x689   : > { %v1346_v38 = vpop.f32.mrf.mxu0 }
 0x68a   : > { %v1352_v39 = vpack.c.bf16 %v1346_v38, %v1346_v38 }
 0x68b   : > { %v2609_v40 = vpop.f32.mrf.mxu0 }
 0x68c   : > { %2614 = vmatmul.mubr.msk.bf16.vlgmr.msra.gmra.mxu1 %vm1124_vm3, %v1352_v39 }
 0x68d   : > { %2624 = vmatpush3.bf16.xpose.msra.mxu1 %v1459_v41  ;;  %v1349_v42 = vpop.f32.mrf.mxu0  ;;  %2625 = vmatprep.mubr.msk.bf16.mxu1 %vm3336_vm1, %v3335_v31 }
 0x68e   : > { %2635 = vmatprep.subr.bf16.mxu1 %v3335_v31 }
 0x68f   : > { %v2610_v43 = vpop.f32.mrf.mxu0 }
 0x694   : > { %2626 = vmatmul.mubr.msk.bf16.vlgmr.msra.gmra.mxu1 %vm1124_vm3, %v3845_v14 }
 0x695   : > { %2636 = vmatpush3.bf16.xpose.msra.mxu1 %v1576_v45  ;;  %2637 = vmatprep.mubr.msk.bf16.mxu1 %vm3336_vm1, %v3335_v31 }
 0x696   : > { %2647 = vmatprep.subr.bf16.mxu1 %v3335_v31 }
 0x69c   : > { %2638 = vmatmul.mubr.msk.bf16.vlgmr.msra.gmra.mxu1 %vm1124_vm3, %v1569_v46 }
 0x69d   : > { %2648 = vmatpush3.bf16.msra.mxu1 %v2845_v28  ;;  %2649 = vmatprep.mubr.msk.bf16.mxu1 %vm3336_vm1, %v3335_v31 }
 0x69e   : > { %2659 = vmatprep.subr.bf16.mxu1 %v3335_v31 }
 0x744   : > { %v1445_v47 = vpop.f32.mrf.mxu0 }
 0x746   : > { %v2621_v48 = vpop.f32.mrf.mxu0 }
 0x748   : > { %v1448_v49 = vpop.f32.mrf.mxu0 }
 0x74a   : > { %v2622_v51 = vpop.f32.mrf.mxu0 }
 0x74c   : > { %v1396_v53 = vpop.f32.mrf.mxu1 }
 0x74d   : > { %v1446_v54 = vadd.f32 %v1445_v47, %v1396_v53 }
 0x74e   : > { %v2615_v55 = vpop.f32.mrf.mxu1 }
 0x74f   : > { %v1774_v9 = vadd.f32 %v3898_v52, %v1446_v54 }
 0x750   : > { %v1399_v57 = vpop.f32.mrf.mxu1 }
 0x751   : > { %v1776_v10 = vadd.f32 %v1774_v9, %v3799_v33 }
 0x752   : > { %v2616_v58 = vpop.f32.mrf.mxu1 }
 0x753   : > { %v1780_v11 = vsel %vm1070_vm2, %v1776_v10, 0.0 }
 0x754   : > { %v1495_v60 = vpop.f32.mrf.mxu1 }
 0x755   : > { %v1501_v61 = vmul.f32 0.25, %v1495_v60 }
 0x756   : > { %v2627_v62 = vpop.f32.mrf.mxu1 }
 0x757   : > { %v1506_v63 = vadd.f32 %v1505_v59, %v1501_v61 }
 0x758   : > { %v1498_v0 = vpop.f32.mrf.mxu1 }
 0x759   : > { %v1507_v1 = vsel %vm1177_vm4, %v1506_v63, -inf }
 0x75a   : > { %1508 = vmax.xlane.f32.xlu0 %v1507_v1  ;;  %v2628_v2 = vpop.f32.mrf.mxu1 }
 0x75c   : > { %v1612_v3 = vpop.f32.mrf.mxu1 }
 0x75d   : > { %v1618_v4 = vmul.f32 0.25, %v1612_v3 }
 0x75e   : > { %v2639_v5 = vpop.f32.mrf.mxu1 }
 0x75f   : > { %v1619_v6 = vadd.f32 %v1618_v4, %v1505_v59 }
 0x760   : > { %v1615_v7 = vpop.f32.mrf.mxu1 }
 0x761   : > { %v1620_v50 = vsel %vm1177_vm4, %v1619_v6, -inf  ;;  %v2847_v7 = vld [vmem:[%s3778_s23] sm:$0xff]  }
 0x762   : > { %1621 = vmax.xlane.f32.xlu1 %v1620_v50  ;;  %v2640_v8 = vpop.f32.mrf.mxu1 }
 0x773   : > { %1519 = vrot.lane.b32.xlu1 %v3845_v14, %s3340_s27  ;;  %s4108_s27 = sld [smem:[#allocation42_spill]] (!%p2521_p3) }
 0x797   : > { %1781 = vadd.xlane.f32.xlu1 %v1780_v11 }
 0x7e3   : > { %v1509_v12 = vpop.xlane.xlu0 %1508 }
 0x7e4   : > { %v1510_v13 = vsub.f32 %v1506_v63, %v1509_v12 }
 0x7e6   : > { %v1511_v15 = vmul.f32 1.442695, %v1510_v13  ;;  %v2507_v13 = vld [vmem:[%s4100_s24] ss:$0 sm:$0xff] }
 0x7e8   : > { %2860 = vpow2.f32 %v1511_v15 }
 0x7eb   : > { %v1622_v16 = vpop.xlane.xlu1 %1621 }
 0x7ec   : > { %v1623_v17 = vsub.f32 %v1619_v6, %v1622_v16  ;;  %v2846_v6 = vld [vmem:[%s3778_s23 + $0x8] sm:$0xff]   ;;  %s4101_s23 = scalar_lea.vmem [#allocation14], %s3745_s19 }
 0x7ee   : > { %v1624_v18 = vmul.f32 1.442695, %v1623_v17 }
 0x7ef   : > { %v1520_v19 = vpop.permute.xlu1 %1519 }
 0x7f0   : > { %2862 = vpow2.f32 %v1624_v18  ;;  %v1525_v20 = vsel %vm1195_vm5, %v1520_v19, 0  ;;  %v2508_v18 = vld [vmem:[%s4101_s23] ss:$0 sm:$0xff] }
 0x7f1   : > { %2630 = vmatpush3.bf16.msra.mxu0 %v1525_v20 }
 0x7f2   : > { %2641 = vmatprep.subr.bf16.mxu0 %v3335_v31 }
 0x7f5   : > { %v2861_v21 = vpop.eup %2860 }
 0x7f6   : > { %v1513_v33 = vsel %vm1177_vm4, %v2861_v21, 0.0 }
 0x7f7   : > { %1514 = vadd.xlane.f32.xlu0 %v1513_v33 }
 0x7fd   : > { %v2863_v22 = vpop.eup %2862 }
 0x7fe   : > { %v1626_v23 = vsel %vm1177_vm4, %v2863_v22, 0.0 }
 0x7ff   : > { %1627 = vadd.xlane.f32.xlu0 %v1626_v23  ;;  %v2849_v23 = vld [vmem:[%s3783_s16 + $0x10] sm:$0xff]  }
 0x815   : > { %1632 = vrot.lane.b32.xlu0 %v3845_v14, %s3341_s10 }
 0x820   : > { %v1782_v24 = vpop.xlane.xlu1 %1781 }
 0x821   : > { %v1787_v25 = vmul.f32 0.03125, %v1782_v24  ;;  %v2850_v24 = vld [vmem:[%s3783_s16 + $0x8] sm:$0xff]  }
 0x823   : > { %v3909_v26 = vsub.f32 %v1776_v10, %v1787_v25  ;;  %v2851_v25 = vld [vmem:[%s3783_s16] sm:$0xff]  }
 0x825   : > { %v1791_v28 = vmul.f32 %v3909_v26, %v3909_v26 }
 0x827   : > { %v1793_v29 = vsel %vm1070_vm2, %v1791_v28, 0.0 }
 0x828   : > { %1794 = vadd.xlane.f32.xlu1 %v1793_v29 }
 0x880   : > { %v1515_v30 = vpop.xlane.xlu0 %1514 }
 0x881   : > { %2864 = vrcp.f32 %v1515_v30 }
 0x888   : > { %v1628_v32 = vpop.xlane.xlu0 %1627 }
 0x889   : > { %2866 = vrcp.f32 %v1628_v32 }
 0x88c   : > { %v1633_v37 = vpop.permute.xlu0 %1632 }
 0x88d   : > { %v1638_v14 = vsel %vm1195_vm5, %v1633_v37, 0 }
 0x88e   : > { %v2865_v35 = vpop.eup %2864 }
 0x88f   : > { %v1517_v36 = vmul.f32 %v2865_v35, %v2861_v21 }
 0x891   : > { %v1518_v38 = vpack.c.bf16 %v1517_v36, %v1517_v36 }
 0x893   : > { %2632 = vmatmul.mubr.msk.bf16.vlgmr.msra.gmra.mxu0 %vm1177_vm4, %v1518_v38 }
 0x894   : > { %2642 = vmatpush3.bf16.msra.mxu0 %v1638_v14  ;;  %2643 = vmatprep.mubr.msk.bf16.mxu0 %vm3336_vm1, %v3335_v31 }
 0x895   : > { %2653 = vmatprep.subr.bf16.mxu0 %v3335_v31 }
 0x896   : > { %v2867_v39 = vpop.eup %2866 }
 0x897   : > { %v1630_v40 = vmul.f32 %v2867_v39, %v2863_v22  ;;  %v2848_v22 = vld [vmem:[%s3783_s16 + $0x18] sm:$0xff]   ;;  %s4103_s16 = scalar_lea.vmem [#allocation16], %s3745_s19 }
 0x899   : > { %v1631_v41 = vpack.c.bf16 %v1630_v40, %v1630_v40 }
 0x89b   : > { %2644 = vmatmul.mubr.msk.bf16.vlgmr.msra.gmra.mxu0 %vm1177_vm4, %v1631_v41 }
 0x89c   : > { %2654 = vmatpush3.bf16.msra.mxu0 %v3866_v27  ;;  %2655 = vmatprep.mubr.msk.bf16.mxu0 %vm3336_vm1, %v3335_v31 }
 0x89d   : > { %2667 = vmatprep.subr.bf16.mxu0 %v3335_v31 }
 0x953   : > { %v1561_v42 = vpop.f32.mrf.mxu0 }
 0x954   : > { %v1567_v43 = vpack.c.bf16 %v1561_v42, %v1561_v42 }
 0x955   : > { %v2633_v44 = vpop.f32.mrf.mxu0 }
 0x956   : > { %2656 = vmatmul.mubr.msk.bf16.vlgmr.msra.gmra.mxu0 %vm1124_vm3, %v1567_v43 }
 0x957   : > { %v1564_v45 = vpop.f32.mrf.mxu0  ;;  %2675 = vmatprep.mubr.msk.bf16.mxu0 %vm3336_vm1, %v3335_v31  ;;  %2668 = vmatpush3.bf16.msra.mxu0 %v2848_v22 }
 0x958   : > { %2669 = vmatprep.subr.bf16.mxu0 %v3335_v31 }
 0x959   : > { %v2634_v46 = vpop.f32.mrf.mxu0 }
 0x95b   : > { %v1674_v47 = vpop.f32.mrf.mxu0  ;;  %2670 = vmatpush3.bf16.msra.mxu0 %v2849_v23 }
 0x95c   : > { %v1680_v48 = vpack.c.bf16 %v1674_v47, %v1674_v47  ;;  %2671 = vmatprep.subr.bf16.mxu0 %v3335_v31 }
 0x95d   : > { %v2645_v49 = vpop.f32.mrf.mxu0 }
 0x95e   : > { %2650 = vmatmul.mubr.msk.bf16.vlgmr.msra.gmra.mxu1 %vm1124_vm3, %v1680_v48 }
 0x95f   : > { %v1677_v27 = vpop.f32.mrf.mxu0  ;;  %2663 = vmatprep.mubr.msk.bf16.mxu1 %vm3336_vm1, %v3335_v31  ;;  %2660 = vmatpush3.bf16.msra.mxu1 %v2846_v6 }
 0x960   : > { %2661 = vmatprep.subr.bf16.mxu1 %v3335_v31  ;;  %2672 = vmatpush3.bf16.msra.mxu0 %v2850_v24 }
 0x961   : > { %v2646_v51 = vpop.f32.mrf.mxu0  ;;  %2673 = vmatprep.subr.bf16.mxu0 %v3335_v31 }
 0x963   : > { %2662 = vmatpush3.bf16.msra.mxu1 %v2847_v7 }
 0x964   : > { %2674 = vmatpush3.bf16.msra.mxu0 %v2851_v25 }
 0xa16   : > { %v1761_v53 = vpop.f32.mrf.mxu0 }
 0xa18   : > { %v2657_v54 = vpop.f32.mrf.mxu0 }
 0xa1a   : > { %v1764_v55 = vpop.f32.mrf.mxu0 }
 0xa1b   : > { %v2513_v55 = vld [vmem:[%s4103_s16] ss:$0 sm:$0xff] }
 0xa1c   : > { %v2658_v56 = vpop.f32.mrf.mxu0 }
 0xa1e   : > { %v1718_v57 = vpop.f32.mrf.mxu1 }
 0xa1f   : > { %v1762_v58 = vadd.f32 %v1761_v53, %v1718_v57 }
 0xa20   : > { %v2651_v59 = vpop.f32.mrf.mxu1 }
 0xa21   : > { %v1775_v60 = vadd.f32 %v3898_v52, %v1762_v58 }
 0xa22   : > { %v1721_v61 = vpop.f32.mrf.mxu1 }
 0xa23   : > { %v1777_v62 = vadd.f32 %v1775_v60, %v3801_v34  ;;  %v1795_v34 = vpop.xlane.xlu1 %1794 }
 0xa24   : > { %v2652_v63 = vpop.f32.mrf.mxu1  ;;  %v1799_v50 = vmul.f32 0.03125, %v1795_v34 }
 0xa25   : > { %v1783_v0 = vsel %vm1070_vm2, %v1777_v62, 0.0 }
 0xa26   : > { %1784 = vadd.xlane.f32.xlu0 %v1783_v0  ;;  %v1801_v8 = vadd.f32 1e-12, %v1799_v50 }
 0xa28   : > { %2868 = vrsqrt.f32 %v1801_v8 }
 0xa35   : > { %v2869_v11 = vpop.eup %2868 }
 0xa36   : > { %v1805_v12 = vmul.f32 %v2869_v11, %v3909_v26  ;;  %v2509_v26 = vld [vmem:[%s4102_s20] ss:$0 sm:$0xff] }
 0xa38   : > { %v1813_v17 = vmul.f32 %v2507_v13, %v1805_v12 }
 0xa3a   : > { %v1821_v20 = vadd.f32 %v2508_v18, %v1813_v17  ;;  %v2519_v17 = vld [vmem:[%s4104_s0] ss:$0 sm:$0xff] }
 0xaaf   : > { %v1785_v1 = vpop.xlane.xlu0 %1784 }
 0xab0   : > { %v1788_v2 = vmul.f32 0.03125, %v1785_v1 }
 0xab2   : > { %v1790_v3 = vsub.f32 %v1777_v62, %v1788_v2 }
 0xab4   : > { %v1792_v4 = vmul.f32 %v1790_v3, %v1790_v3 }
 0xab6   : > { %v1796_v5 = vsel %vm1070_vm2, %v1792_v4, 0.0 }
 0xab7   : > { %1797 = vadd.xlane.f32.xlu0 %v1796_v5 }
 0xb40   : > { %v1798_v52 = vpop.xlane.xlu0 %1797 }
 0xb41   : > { %v1800_v9 = vmul.f32 0.03125, %v1798_v52 }
 0xb43   : > { %v1802_v10 = vadd.f32 1e-12, %v1800_v9 }
 0xb45   : > { %2870 = vrsqrt.f32 %v1802_v10 }
 0xb52   : > { %v2871_v15 = vpop.eup %2870 }
 0xb53   : > { %v1806_v16 = vmul.f32 %v2871_v15, %v1790_v3 }
 0xb55   : > { %v1814_v19 = vmul.f32 %v2507_v13, %v1806_v16 }
 0xb57   : > { %v1822_v21 = vadd.f32 %v2508_v18, %v1814_v19  ;;  %v2520_v19 = vld [vmem:[%s4105_s22] ss:$0 sm:$0xff] }
 0xb59   : > { %v1828_v33 = vpack.c.bf16 %v1822_v21, %v1821_v20 }
 0xb5b   : > { %2664 = vmatmul.mubr.msk.bf16.vlgmr.msra.gmra.mxu1 %vm1070_vm2, %v1828_v33 }
 0xc1b   : > { %v1884_v28 = vpop.f32.mrf.mxu1 }
 0xc1c   : > { %v1885_v29 = vadd.f32 %v2509_v26, %v1884_v28 }
 0xc1d   : > { %v2665_v30 = vpop.f32.mrf.mxu1 }
 0xc1e   : > { %v1891_v32 = vmul.f32 %v1885_v29, %v1885_v29 }
 0xc1f   : > { %v1887_v35 = vpop.f32.mrf.mxu1 }
 0xc20   : > { %v1893_v36 = vmul.f32 %v1891_v32, %v1885_v29  ;;  %v1888_v37 = vadd.f32 %v2509_v26, %v1887_v35 }
 0xc21   : > { %v2666_v38 = vpop.f32.mrf.mxu1 }
 0xc22   : > { %v1895_v14 = vmul.f32 0.044715, %v1893_v36  ;;  %v1892_v39 = vmul.f32 %v1888_v37, %v1888_v37 }
 0xc24   : > { %v1897_v40 = vadd.f32 %v1895_v14, %v1885_v29  ;;  %v1894_v41 = vmul.f32 %v1892_v39, %v1888_v37 }
 0xc26   : > { %v1899_v42 = vmul.f32 0.7978846, %v1897_v40  ;;  %v1896_v43 = vmul.f32 0.044715, %v1894_v41 }
 0xc28   : > { %2872 = vtanh.f32 %v1899_v42  ;;  %v1898_v31 = vadd.f32 %v1896_v43, %v1888_v37 }
 0xc2a   : > { %v1900_v44 = vmul.f32 0.7978846, %v1898_v31 }
 0xc2c   : > { %2874 = vtanh.f32 %v1900_v44 }
 0xc35   : > { %v2873_v45 = vpop.eup %2872 }
 0xc36   : > { %v1903_v46 = vadd.f32 1.0, %v2873_v45 }
 0xc38   : > { %v1905_v48 = vmul.f32 0.5, %v1903_v46 }
 0xc39   : > { %v2875_v47 = vpop.eup %2874 }
 0xc3a   : > { %v1904_v49 = vadd.f32 1.0, %v2875_v47  ;;  %v1907_v51 = vmul.f32 %v1905_v48, %v1885_v29 }
 0xc3c   : > { %v1906_v27 = vmul.f32 0.5, %v1904_v49 }
 0xc3e   : > { %v1908_v53 = vmul.f32 %v1906_v27, %v1888_v37 }
 0xc40   : > { %v1918_v54 = vpack.c.bf16 %v1908_v53, %v1907_v51 }
 0xc42   : > { %2676 = vmatmul.mubr.msk.bf16.vlgmr.msra.gmra.mxu0 %vm1949_vm6, %v1918_v54 }
 0xd02   : > { %v1987_v56 = vpop.f32.mrf.mxu0 }
 0xd03   : > { %v1988_v57 = vadd.f32 %v2513_v55, %v1987_v56 }
 0xd04   : > { %v2677_v58 = vpop.f32.mrf.mxu0 }
 0xd05   : > { %v1994_v59 = vadd.f32 %v1988_v57, %v1821_v20 }
 0xd06   : > { %v1990_v60 = vpop.f32.mrf.mxu0 }
 0xd07   : > { %v1991_v61 = vadd.f32 %v2513_v55, %v1990_v60  ;;  %v1998_v62 = vsel %vm1070_vm2, %v1994_v59, 0.0 }
 0xd08   : > { %1999 = vadd.xlane.f32.xlu1 %v1998_v62  ;;  %v2678_v63 = vpop.f32.mrf.mxu0 }
 0xd09   : > { %v1995_v0 = vadd.f32 %v1991_v61, %v1822_v21 }
 0xd0b   : > { %v2001_v1 = vsel %vm1070_vm2, %v1995_v0, 0.0 }
 0xd0c   : > { %2002 = vadd.xlane.f32.xlu0 %v2001_v1 }
 0xd91   : > { %v2000_v2 = vpop.xlane.xlu1 %1999 }
 0xd92   : > { %v2004_v3 = vmul.f32 0.03125, %v2000_v2 }
 0xd94   : > { %v2006_v4 = vsub.f32 %v1994_v59, %v2004_v3 }
 0xd95   : > { %v2003_v5 = vpop.xlane.xlu0 %2002 }
 0xd96   : > { %v2005_v6 = vmul.f32 0.03125, %v2003_v5  ;;  %v2008_v7 = vmul.f32 %v2006_v4, %v2006_v4 }
 0xd98   : > { %v2007_v34 = vsub.f32 %v1995_v0, %v2005_v6  ;;  %v2010_v50 = vsel %vm1070_vm2, %v2008_v7, 0.0 }
 0xd99   : > { %2011 = vadd.xlane.f32.xlu1 %v2010_v50 }
 0xd9a   : > { %v2009_v8 = vmul.f32 %v2007_v34, %v2007_v34 }
 0xd9c   : > { %v2013_v52 = vsel %vm1070_vm2, %v2009_v8, 0.0 }
 0xd9d   : > { %2014 = vadd.xlane.f32.xlu0 %v2013_v52 }
 0xe22   : > { %v2012_v9 = vpop.xlane.xlu1 %2011 }
 0xe23   : > { %v2016_v10 = vmul.f32 0.03125, %v2012_v9 }
 0xe25   : > { %v2018_v11 = vadd.f32 1e-12, %v2016_v10 }
 0xe26   : > { %v2015_v12 = vpop.xlane.xlu0 %2014 }
 0xe27   : > { %2876 = vrsqrt.f32 %v2018_v11  ;;  %v2017_v13 = vmul.f32 0.03125, %v2015_v12 }
 0xe29   : > { %v2019_v15 = vadd.f32 1e-12, %v2017_v13 }
 0xe2b   : > { %2878 = vrsqrt.f32 %v2019_v15 }
 0xe34   : > { %v2877_v16 = vpop.eup %2876 }
 0xe35   : > { %v2022_v18 = vmul.f32 %v2877_v16, %v2006_v4 }
 0xe37   : > { %v2030_v20 = vmul.f32 %v2519_v17, %v2022_v18 }
 0xe38   : > { %v2879_v21 = vpop.eup %2878 }
 0xe39   : > { %v2038_v33 = vadd.f32 %v2520_v19, %v2030_v20  ;;  %v2023_v22 = vmul.f32 %v2879_v21, %v2007_v34 }
 0xe3b   : > { %2040 = vst.msk [vmem:[#allocation2] sm:$0xff] %vm1070_vm2, %v2038_v33  ;;  %v2031_v23 = vmul.f32 %v2519_v17, %v2023_v22  ;;  %2045 = sbr.rel (%p2521_p3) target bundleno = 4067 (0xfe3), region = 160 }
 0xe3d   : > { %v2039_v24 = vadd.f32 %v2520_v19, %v2031_v23 }
 0xe3f   : > { %2041 = vst.msk [vmem:[#allocation2 + $0x8] sm:$0xff] %vm1070_vm2, %v2039_v24 }
 0xe40   : > { %v2880_v25 = vld [vmem:[%s4106_s12 + $0x8] sm:$0xff]   ;;  %v3342_v26 = vmov 0.0   ;;  %v2881_v28 = vld [vmem:[%s4106_s12] sm:$0xff]   ;;  %vm3343_vm7 = vmmov 0   ;;  %v2047_v29 = vrot.slane %v2039_v24, 7  ;;  %vm2049_vm8 = vcmask 1040384  }
 0xe41   : > { %2679 = vmatprep.subr.bf16.mxu0 %v3342_v26  ;;  %2687 = vmatprep.subr.bf16.mxu1 %v3342_v26  ;;  %v2882_v35 = vld [vmem:[%s4107_s26 + $0x8] sm:$0xff]   ;;  %v2883_v36 = vld [vmem:[%s4107_s26] sm:$0xff]   ;;  %v2522_v37 = vld [vmem:[#allocation19] ss:$0 sm:$0xff] }
 0xe42   : > { %2680 = vmatpush3.bf16.msra.mxu0 %v2880_v25  ;;  %2683 = vmatprep.mubr.msk.bf16.mxu0 %vm3343_vm7, %v3342_v26  ;;  %v2050_v30 = vsel %vm2049_vm8, %v2038_v33, %v2047_v29  ;;  %v2526_v31 = vld [vmem:[%s4108_s27] ss:$0 sm:$0xff] }
 0xe43   : > { %2681 = vmatprep.subr.bf16.mxu0 %v3342_v26  ;;  %2691 = vmatprep.mubr.msk.bf16.mxu1 %vm3343_vm7, %v3342_v26  ;;  %v2056_v32 = vpack.c.bf16 %v2050_v30, %v2050_v30 }
 0xe44   : > { %2688 = vmatpush3.bf16.msra.mxu1 %v2882_v35 }
 0xe45   : > { %2689 = vmatprep.subr.bf16.mxu1 %v3342_v26 }
 0xe46   : > { %2682 = vmatpush3.bf16.msra.mxu0 %v2881_v28 }
 0xe48   : > { %2690 = vmatpush3.bf16.msra.mxu1 %v2883_v36 }
 0xe49   : > { %2684 = vmatmul.mubr.msk.bf16.vlgmr.msra.gmra.mxu0 %vm1070_vm2, %v2056_v32 }
 0xf09   : > { %v2112_v38 = vpop.f32.mrf.mxu0 }
 0xf0a   : > { %v2113_v14 = vadd.f32 %v2522_v37, %v2112_v38 }
 0xf0b   : > { %v2685_v39 = vpop.f32.mrf.mxu0 }
 0xf0c   : > { %2884 = vtanh.f32 %v2113_v14 }
 0xf0d   : > { %v2115_v40 = vpop.f32.mrf.mxu0 }
 0xf0f   : > { %v2686_v41 = vpop.f32.mrf.mxu0 }
 0xf19   : > { %v2885_v42 = vpop.eup %2884 }
 0xf1a   : > { %v2124_v43 = vpack.c.bf16 %v2885_v42, %v2885_v42 }
 0xf1c   : > { %2692 = vmatmul.mubr.msk.bf16.vlgmr.msra.gmra.mxu1 %vm1070_vm2, %v2124_v43 }
 0xfdc   : > { %v2180_v44 = vpop.f32.mrf.mxu1 }
 0xfdd   : > { %v2181_v45 = vadd.f32 %v2526_v31, %v2180_v44 }
 0xfde   : > { %v2693_v46 = vpop.f32.mrf.mxu1 }
 0xfdf   : > { %2186 = vst [vmem:[#allocation20] sm:$0x3] %v2181_v45 }
 0xfe0   : > { %v2183_v47 = vpop.f32.mrf.mxu1 }
 0xfe2   : > { %v2694_v48 = vpop.f32.mrf.mxu1 }
 0xfe3 PF: > { %p2787_p0 = scmp.eq.s32.totalorder %s3469_s2, 1  ;;  %s3344_s10 = smov [#allocation20]  }
 0xfe4   : > { %s2194_s21 = sshll.u32 %s3344_s10, 4  ;;  %s2195_s21 = int_to_ptr.vmem [resolvable:$true] %s2194_s21 }
 0xfe5   : > { %s3240_s24 = scalar_lea.vmem %s2195_s21, 32  ;;  %p3247_p11 = scmp.lt.s32.totalorder %s2195_s21, %s2195_s21 }
 0xfe6   : > { %p3241_p4 = scmp.ne.s32.totalorder %s2195_s21, %s3240_s24  ;;  %p3248_p7 = scmp.lt.s32.totalorder %s3240_s24, %s3240_s24 }
 0xfe8   : > { %p3242_p8 = pnand %p3241_p4, %p2787_p0  ;;  %p3249_p10 = por %p3248_p7, %p3247_p11 }
 0xfea   : > { %p3243_p1 = pneg %p3242_p8 }
 0xfec   : > { %p3250_p12 = pnand %p3249_p10, %p3243_p1 }
 0xfee   : > { %3253 = shalt.err (!%p3250_p12)
}
 0xfef   : > { %s4109_s16 = sld [smem:[#allocation43_spill]] }
 0xff5   : > { %2732 = dma.vmem_to_hbm [thread:$0]  (%p2787_p0), %s2195_s21, 32, %s4109_s16, [#allocation5]  }
 0xff6   : > { %3301 = dma.done.wait (%p2787_p0), [#allocation5], 32  }
 0xff7   : > { %3303 = vsyncadd (%p2787_p0), [#allocation5], 4294967264 }
 0xff8 PF: > { %s4110_s24 = sld [smem:[#allocation29_spill]] }
 0xff9   : > { %s4111_s1 = sld [smem:[#allocation27_spill]] }
 0xffa   : > { %s4112_s22 = sld [smem:[#allocation28_spill]] }
 0xffb   : > { %s4113_s23 = sld [smem:[#allocation30_spill]] }
 0xffe   : > { %p31_p13 = scmp.ge.s32.totalorder %s4110_s24, 4  }
0x1000   :  { %33 = sbr.rel (!%p31_p13) target bundleno = 18 (0x12), region = 253 }
0x1005   :  { %2207 = vsyncpa [#allocation4], 1 }
0x1006   :  { %2209 = vsyncpa [#allocation4 + $0x1], 1 }
0x1007   :  { %2210 = vsyncpa [#allocation7], 1 }
0x1008   :  { %2211 = vsyncpa [#allocation10], 1 }
0x1009   :  { %2212 = vsyncpa [#allocation5], 1 }
0x100a   :  { %2214 = vsyncpa [#allocation5 + $0x1], 1 }

</bundles_post_ra>
